<compile_context>
chip_gen: v5e
topology: v5e:2x2
jax: 0.10.0
libtpu: 0.0.40
codegen_flags: <defaults>
</compile_context>

<pallas_src>
import functools

import jax
import jax.numpy as jnp
from jax import lax
from jax.experimental import pallas as pl
from jax.experimental.pallas import tpu as pltpu

LN_EPS = 1e-5
LANE = 128
SUBLANE = 8


def _round_up(n, m):
    return ((n + m - 1) // m) * m


def _pad2(a, rows, cols):
    return jnp.pad(a, ((0, rows - a.shape[0]), (0, cols - a.shape[1])))


# ----------------------------------------------------------------------------
# Kernel body: one batch tile.
# ----------------------------------------------------------------------------
def rnn_cell_kernel(x_ref, h_ref, w_in_ref, w_hh_ref, hvec_ref,
                    w_out_ref, b_out_ref, out_ref, hid_ref,
                    *, inv_h, precision):
    # inner = x @ W_in + h @ W_hh + (b_in + b_hh), accumulated in f32.
    inner = jnp.dot(x_ref[...], w_in_ref[...],
                    preferred_element_type=jnp.float32, precision=precision)
    inner = inner + jnp.dot(h_ref[...], w_hh_ref[...],
                            preferred_element_type=jnp.float32,
                            precision=precision)
    inner = inner + hvec_ref[0:1, :]          # fused bias row

    # Single-pass LayerNorm over the lane axis.  Padded feature columns of
    # `inner` are exactly zero (zero-padded weight columns + zero bias), so
    # dividing raw sums by the *true* hidden size gives exact statistics.
    s1 = jnp.sum(inner, axis=-1, keepdims=True)
    s2 = jnp.sum(inner * inner, axis=-1, keepdims=True)
    mean = s1 * inv_h
    var = s2 * inv_h - mean * mean
    normed = (inner - mean) * lax.rsqrt(var + LN_EPS)
    # gamma/beta are zero in padded columns -> padded hidden columns stay 0.
    normed = normed * hvec_ref[1:2, :] + hvec_ref[2:3, :]

    hidden = jnp.tanh(normed)
    # dropout: identity (eval mode)

    out = jnp.dot(hidden.astype(w_out_ref.dtype), w_out_ref[...],
                  preferred_element_type=jnp.float32, precision=precision)
    out = out + b_out_ref[...]

    out_ref[...] = out.astype(out_ref.dtype)
    hid_ref[...] = hidden.astype(hid_ref.dtype)


# ----------------------------------------------------------------------------
# One-time weight preparation (call once, reuse every step).
# ----------------------------------------------------------------------------
def prepare_params(params, *, matmul_dtype=None):
    """Lane-pad, fuse and (optionally) cast weights once.

    matmul_dtype: e.g. jnp.bfloat16 to *store* MXU operands in bf16 (halves
    weight HBM/VMEM bytes).  Accumulation / LayerNorm / tanh stay float32.
    """
    input_size, hidden_size = params["w_in"].shape
    output_size = params["w_out"].shape[1]
    Ip = _round_up(input_size, LANE)
    Hp = _round_up(hidden_size, LANE)
    Op = _round_up(output_size, LANE)

    wdt = matmul_dtype if matmul_dtype is not None else params["w_in"].dtype

    w_in = _pad2(params["w_in"], Ip, Hp).astype(wdt)
    w_hh = _pad2(params["w_hh"], Hp, Hp).astype(wdt)
    w_out = _pad2(params["w_out"], Hp, Op).astype(wdt)

    # Pack H-wide per-feature vectors into one (8, Hp) block:
    #   row 0 = b_in + b_hh, row 1 = LN gamma, row 2 = LN beta.
    hvec = jnp.zeros((SUBLANE, Hp), jnp.float32)
    hvec = hvec.at[0, :hidden_size].set(
        (params["b_in"] + params["b_hh"]).reshape(-1).astype(jnp.float32))
    hvec = hvec.at[1, :hidden_size].set(
        params["ln_g"].reshape(-1).astype(jnp.float32))
    hvec = hvec.at[2, :hidden_size].set(
        params["ln_b"].reshape(-1).astype(jnp.float32))

    b_out = _pad2(params["b_out"].astype(jnp.float32), 1, Op)

    return {
        "w_in": w_in, "w_hh": w_hh, "w_out": w_out,
        "hvec": hvec, "b_out": b_out,
        "input_size": input_size, "hidden_size": hidden_size,
        "output_size": output_size, "Ip": Ip, "Hp": Hp, "Op": Op,
    }


def _vmem_limit_bytes(tb, Ip, Hp, Op, mm_dtype, out_dtype, hid_dtype):
    mmb = jnp.dtype(mm_dtype).itemsize
    weights = (Ip * Hp + Hp * Hp + Hp * Op) * mmb \
              + (SUBLANE * Hp + SUBLANE * Op) * 4
    acts_in = 2 * tb * (Ip + Hp) * mmb                       # 2x-buffered inputs
    acts_out = 2 * tb * (Op * jnp.dtype(out_dtype).itemsize
                         + Hp * jnp.dtype(hid_dtype).itemsize)
    interm = 4 * tb * (Hp + Op) * 4                          # f32 temporaries
    est = 2 * (weights + acts_in + acts_out + interm)        # generous headroom
    return int(min(64 * 1024 * 1024, max(est, 4 * 1024 * 1024) + (4 << 20)))


# ----------------------------------------------------------------------------
# Per-step wrapper.
# ----------------------------------------------------------------------------
def rnn_cell_forward(x, prev_h, prepared, *, block_b=256,
                     out_dtype=None, hidden_dtype=None):
    """x: (B, input_size), prev_h: (B, hidden_size) -> (out, hidden).

    `prepared` comes from prepare_params (weights already padded/cast).
    hidden_dtype can be set to bf16 when feeding the next recurrent step to
    halve the (B, H) writeback/read traffic.
    """
    B = x.shape[0]
    Ip, Hp, Op = prepared["Ip"], prepared["Hp"], prepared["Op"]
    hidden_size = prepared["hidden_size"]
    output_size = prepared["output_size"]
    mm_dtype = prepared["w_in"].dtype

    out_dtype = out_dtype if out_dtype is not None else x.dtype
    hidden_dtype = hidden_dtype if hidden_dtype is not None else x.dtype

    # Batch tiling (multiple of the sublane size).  For v7x pick block_b so
    # that nb >= 2 when B is large enough, letting the "parallel" axis shard
    # across both TensorCores.
    tb = min(block_b, _round_up(B, SUBLANE))
    Bp = _round_up(B, tb)
    nb = Bp // tb

    # Per-call activation padding only (weights were prepared once).
    xp = _pad2(x, Bp, Ip).astype(mm_dtype)
    hp = _pad2(prev_h, Bp, Hp).astype(mm_dtype)

    precision = (lax.Precision.HIGHEST if mm_dtype == jnp.float32
                 else lax.Precision.DEFAULT)
    kernel = functools.partial(rnn_cell_kernel,
                               inv_h=1.0 / hidden_size, precision=precision)
    vmem_limit = _vmem_limit_bytes(tb, Ip, Hp, Op,
                                   mm_dtype, out_dtype, hidden_dtype)

    def call(weight_mode):
        def wspec(shape):
            # Constant index_map -> weight stays VMEM-resident across tiles.
            if weight_mode is None:
                return pl.BlockSpec(shape, lambda i: (0, 0))
            return pl.BlockSpec(shape, lambda i: (0, 0),
                                pipeline_mode=weight_mode)

        grid_spec = pltpu.PrefetchScalarGridSpec(
            num_scalar_prefetch=0,
            grid=(nb,),
            in_specs=[
                pl.BlockSpec((tb, Ip), lambda i: (i, 0)),   # x      (batch-tiled)
                pl.BlockSpec((tb, Hp), lambda i: (i, 0)),   # prev_h (batch-tiled)
                wspec((Ip, Hp)),                            # W_in
                wspec((Hp, Hp)),                            # W_hh
                wspec((SUBLANE, Hp)),                       # packed bias/gamma/beta
                wspec((Hp, Op)),                            # W_out
                wspec((1, Op)),                             # b_out
            ],
            out_specs=[
                pl.BlockSpec((tb, Op), lambda i: (i, 0)),   # out
                pl.BlockSpec((tb, Hp), lambda i: (i, 0)),   # hidden
            ],
        )
        return pl.pallas_call(
            kernel,
            out_shape=(
                jax.ShapeDtypeStruct((Bp, Op), out_dtype),
                jax.ShapeDtypeStruct((Bp, Hp), hidden_dtype),
            ),
            grid_spec=grid_spec,
            compiler_params=pltpu.CompilerParams(
                dimension_semantics=("parallel",),
                vmem_limit_bytes=vmem_limit,
            ),
        )(xp, hp, prepared["w_in"], prepared["w_hh"], prepared["hvec"],
          prepared["w_out"], prepared["b_out"])

    try:
        # Single-buffer the constant-index weights (they never re-fetch).
        out_p, hid_p = call(pl.Buffered(1))
    except Exception:  # fallback for jax builds without per-spec pipeline_mode
        out_p, hid_p = call(None)

    return out_p[:B, :output_size], hid_p[:B, :hidden_size]


# ----------------------------------------------------------------------------
# Params / reference (for self-test).
# ----------------------------------------------------------------------------
def init_params(key, input_size, hidden_size, output_size, dtype=jnp.float32):
    """Deterministic init; weights stored as (in_features, out_features)."""
    ks = jax.random.split(key, 6)

    def linear(kw, kb, fan_in, fan_out):
        bound = 1.0 / jnp.sqrt(fan_in)
        w = jax.random.uniform(kw, (fan_in, fan_out), dtype, -bound, bound)
        b = jax.random.uniform(kb, (1, fan_out), dtype, -bound, bound)
        return w, b

    w_in, b_in = linear(ks[0], ks[1], input_size, hidden_size)
    w_hh, b_hh = linear(ks[2], ks[3], hidden_size, hidden_size)
    w_out, b_out = linear(ks[4], ks[5], hidden_size, output_size)
    return {
        "w_in": w_in, "b_in": b_in,
        "w_hh": w_hh, "b_hh": b_hh,
        "ln_g": jnp.ones((1, hidden_size), dtype),
        "ln_b": jnp.zeros((1, hidden_size), dtype),
        "w_out": w_out, "b_out": b_out,
    }


def rnn_cell_reference(x, prev_h, params):
    inner = (prev_h @ params["w_hh"] + params["b_hh"]
             + x @ params["w_in"] + params["b_in"])
    mean = jnp.mean(inner, axis=-1, keepdims=True)
    var = jnp.mean((inner - mean) ** 2, axis=-1, keepdims=True)
    normed = (inner - mean) / jnp.sqrt(var + LN_EPS)
    normed = normed * params["ln_g"] + params["ln_b"]
    hidden = jnp.tanh(normed)
    out = hidden @ params["w_out"] + params["b_out"]
    return out, hidden


if __name__ == "__main__":
    B, input_size, hidden_size, output_size = 8, 16, 32, 8

    key = jax.random.PRNGKey(0)
    kx, kh, kp = jax.random.split(key, 3)
    x = jax.random.normal(kx, (B, input_size), jnp.float32)
    prev_h = jax.random.normal(kh, (B, hidden_size), jnp.float32)
    params = init_params(kp, input_size, hidden_size, output_size)

    ref_out, ref_hidden = rnn_cell_reference(x, prev_h, params)

    # f32-weight path (precision=HIGHEST MXU): matches PyTorch numerics.
    prep_f32 = prepare_params(params)                  # one-time weight prep
    out, hidden = rnn_cell_forward(x, prev_h, prep_f32)
    jax.block_until_ready((out, hidden))
    assert out.shape == (B, output_size) and hidden.shape == (B, hidden_size)
    assert jnp.allclose(out, ref_out, atol=1e-4, rtol=1e-4)
    assert jnp.allclose(hidden, ref_hidden, atol=1e-4, rtol=1e-4)

    # bf16-stored-weight path (f32 accumulation / f32 LayerNorm+tanh).
    prep_bf16 = prepare_params(params, matmul_dtype=jnp.bfloat16)
    out_bf, hid_bf = rnn_cell_forward(x, prev_h, prep_bf16)
    jax.block_until_ready((out_bf, hid_bf))
    assert jnp.allclose(out_bf, ref_out, atol=1e-1, rtol=1e-1)
    assert jnp.allclose(hid_bf, ref_hidden, atol=1e-1, rtol=1e-1)

    print("KERNEL_OK")
</pallas_src>

<mosaic_0001>
module attributes {stable_mosaic.version = 11 : i64} {
  func.func @rnn_cell_kernel(%arg0: i32, %arg1: memref<8x128xf32, #tpu.memory_space<vmem>>, %arg2: memref<8x128xf32, #tpu.memory_space<vmem>>, %arg3: memref<128x128xf32, #tpu.memory_space<vmem>>, %arg4: memref<128x128xf32, #tpu.memory_space<vmem>>, %arg5: memref<8x128xf32, #tpu.memory_space<vmem>>, %arg6: memref<128x128xf32, #tpu.memory_space<vmem>>, %arg7: memref<1x128xf32, #tpu.memory_space<vmem>>, %arg8: memref<8x128xf32, #tpu.memory_space<vmem>>, %arg9: memref<8x128xf32, #tpu.memory_space<vmem>>) attributes {dimension_semantics = [#tpu.dimension_semantics<parallel>], iteration_bounds = array<i64: 1>, scalar_prefetch = 0 : i64, scratch_operands = 0 : i64, tpu.core_type = #tpu.core_type<tc>, window_params = [{transform_indices = @transform_0, window_bounds = array<i64: 8, 128>}, {transform_indices = @transform_1, window_bounds = array<i64: 8, 128>}, {pipeline_mode = #tpu.pipeline_mode<synchronous>, transform_indices = @transform_2, window_bounds = array<i64: 128, 128>}, {pipeline_mode = #tpu.pipeline_mode<synchronous>, transform_indices = @transform_3, window_bounds = array<i64: 128, 128>}, {pipeline_mode = #tpu.pipeline_mode<synchronous>, transform_indices = @transform_4, window_bounds = array<i64: 8, 128>}, {pipeline_mode = #tpu.pipeline_mode<synchronous>, transform_indices = @transform_5, window_bounds = array<i64: 128, 128>}, {pipeline_mode = #tpu.pipeline_mode<synchronous>, transform_indices = @transform_6, window_bounds = array<i64: 1, 128>}, {transform_indices = @transform_7, window_bounds = array<i64: 8, 128>}, {transform_indices = @transform_8, window_bounds = array<i64: 8, 128>}]} {
    %c0 = arith.constant 0 : index
    %c0_0 = arith.constant 0 : index
    %0 = vector.load %arg1[%c0, %c0_0] : memref<8x128xf32, #tpu.memory_space<vmem>>, vector<8x128xf32>
    %c0_1 = arith.constant 0 : index
    %c0_2 = arith.constant 0 : index
    %1 = vector.load %arg3[%c0_1, %c0_2] : memref<128x128xf32, #tpu.memory_space<vmem>>, vector<128x128xf32>
    %cst = arith.constant dense<0.000000e+00> : vector<8x128xf32>
    %2 = tpu.matmul %0, %1, %cst {dimension_numbers = #tpu.dot_dimension_numbers<[1], [0], [0], [1], [0, 0, 1, 1], [], []>, precision = #tpu.contract_precision<fp32>} : vector<8x128xf32>, vector<128x128xf32>, vector<8x128xf32> -> vector<8x128xf32>
    %c0_3 = arith.constant 0 : index
    %c0_4 = arith.constant 0 : index
    %3 = vector.load %arg2[%c0_3, %c0_4] : memref<8x128xf32, #tpu.memory_space<vmem>>, vector<8x128xf32>
    %c0_5 = arith.constant 0 : index
    %c0_6 = arith.constant 0 : index
    %4 = vector.load %arg4[%c0_5, %c0_6] : memref<128x128xf32, #tpu.memory_space<vmem>>, vector<128x128xf32>
    %cst_7 = arith.constant dense<0.000000e+00> : vector<8x128xf32>
    %5 = tpu.matmul %3, %4, %cst_7 {dimension_numbers = #tpu.dot_dimension_numbers<[1], [0], [0], [1], [0, 0, 1, 1], [], []>, precision = #tpu.contract_precision<fp32>} : vector<8x128xf32>, vector<128x128xf32>, vector<8x128xf32> -> vector<8x128xf32>
    %6 = arith.addf %2, %5 : vector<8x128xf32>
    %c0_8 = arith.constant 0 : index
    %c0_9 = arith.constant 0 : index
    %7 = vector.load %arg5[%c0_8, %c0_9] : memref<8x128xf32, #tpu.memory_space<vmem>>, vector<1x128xf32>
    %8 = vector.broadcast %7 : vector<1x128xf32> to vector<8x128xf32>
    %9 = arith.addf %6, %8 : vector<8x128xf32>
    %cst_10 = arith.constant dense<0.000000e+00> : vector<8xf32>
    %10 = vector.multi_reduction <add>, %9, %cst_10 [1] : vector<8x128xf32> to vector<8xf32>
    %11 = vector.shape_cast %10 : vector<8xf32> to vector<8x1xf32>
    %12 = arith.mulf %9, %9 : vector<8x128xf32>
    %cst_11 = arith.constant dense<0.000000e+00> : vector<8xf32>
    %13 = vector.multi_reduction <add>, %12, %cst_11 [1] : vector<8x128xf32> to vector<8xf32>
    %14 = vector.shape_cast %13 : vector<8xf32> to vector<8x1xf32>
    %cst_12 = arith.constant 3.125000e-02 : f32
    %15 = vector.broadcast %cst_12 : f32 to vector<8x1xf32>
    %16 = arith.mulf %11, %15 : vector<8x1xf32>
    %cst_13 = arith.constant 3.125000e-02 : f32
    %17 = vector.broadcast %cst_13 : f32 to vector<8x1xf32>
    %18 = arith.mulf %14, %17 : vector<8x1xf32>
    %19 = arith.mulf %16, %16 : vector<8x1xf32>
    %20 = arith.subf %18, %19 : vector<8x1xf32>
    %21 = vector.broadcast %16 : vector<8x1xf32> to vector<8x128xf32>
    %22 = arith.subf %9, %21 : vector<8x128xf32>
    %cst_14 = arith.constant 9.99999974E-6 : f32
    %23 = vector.broadcast %cst_14 : f32 to vector<8x1xf32>
    %24 = arith.addf %20, %23 : vector<8x1xf32>
    %25 = math.rsqrt %24 : vector<8x1xf32>
    %26 = vector.broadcast %25 : vector<8x1xf32> to vector<8x128xf32>
    %27 = arith.mulf %22, %26 : vector<8x128xf32>
    %c1 = arith.constant 1 : index
    %c0_15 = arith.constant 0 : index
    %28 = vector.load %arg5[%c1, %c0_15] : memref<8x128xf32, #tpu.memory_space<vmem>>, vector<1x128xf32>
    %29 = vector.broadcast %28 : vector<1x128xf32> to vector<8x128xf32>
    %30 = arith.mulf %27, %29 : vector<8x128xf32>
    %c2 = arith.constant 2 : index
    %c0_16 = arith.constant 0 : index
    %31 = vector.load %arg5[%c2, %c0_16] : memref<8x128xf32, #tpu.memory_space<vmem>>, vector<1x128xf32>
    %32 = vector.broadcast %31 : vector<1x128xf32> to vector<8x128xf32>
    %33 = arith.addf %30, %32 : vector<8x128xf32>
    %34 = math.tanh %33 : vector<8x128xf32>
    %c0_17 = arith.constant 0 : index
    %c0_18 = arith.constant 0 : index
    %35 = vector.load %arg6[%c0_17, %c0_18] : memref<128x128xf32, #tpu.memory_space<vmem>>, vector<128x128xf32>
    %cst_19 = arith.constant dense<0.000000e+00> : vector<8x128xf32>
    %36 = tpu.matmul %34, %35, %cst_19 {dimension_numbers = #tpu.dot_dimension_numbers<[1], [0], [0], [1], [0, 0, 1, 1], [], []>, precision = #tpu.contract_precision<fp32>} : vector<8x128xf32>, vector<128x128xf32>, vector<8x128xf32> -> vector<8x128xf32>
    %c0_20 = arith.constant 0 : index
    %c0_21 = arith.constant 0 : index
    %37 = vector.load %arg7[%c0_20, %c0_21] : memref<1x128xf32, #tpu.memory_space<vmem>>, vector<1x128xf32>
    %38 = vector.broadcast %37 : vector<1x128xf32> to vector<8x128xf32>
    %39 = arith.addf %36, %38 : vector<8x128xf32>
    %c0_22 = arith.constant 0 : index
    %c0_23 = arith.constant 0 : index
    %40 = vector.load %arg8[%c0_22, %c0_23] : memref<8x128xf32, #tpu.memory_space<vmem>>, vector<8x128xf32>
    tpu.vector_store %arg8[%c0_22, %c0_23], %39 {strides = array<i32>} : memref<8x128xf32, #tpu.memory_space<vmem>>, vector<8x128xf32>,
    %c0_24 = arith.constant 0 : index
    %c0_25 = arith.constant 0 : index
    %41 = vector.load %arg9[%c0_24, %c0_25] : memref<8x128xf32, #tpu.memory_space<vmem>>, vector<8x128xf32>
    tpu.vector_store %arg9[%c0_24, %c0_25], %34 {strides = array<i32>} : memref<8x128xf32, #tpu.memory_space<vmem>>, vector<8x128xf32>,
    return
  }
  func.func @transform_0(%arg0: i32) -> (i32, i32) {
    %c0_i32 = arith.constant 0 : i32
    %c0_i32_0 = arith.constant 0 : i32
    return %arg0, %c0_i32 : i32, i32
  }
  func.func @transform_1(%arg0: i32) -> (i32, i32) {
    %c0_i32 = arith.constant 0 : i32
    %c0_i32_0 = arith.constant 0 : i32
    return %arg0, %c0_i32 : i32, i32
  }
  func.func @transform_2(%arg0: i32) -> (i32, i32) {
    %c0_i32 = arith.constant 0 : i32
    %c0_i32_0 = arith.constant 0 : i32
    %c0_i32_1 = arith.constant 0 : i32
    return %c0_i32, %c0_i32_0 : i32, i32
  }
  func.func @transform_3(%arg0: i32) -> (i32, i32) {
    %c0_i32 = arith.constant 0 : i32
    %c0_i32_0 = arith.constant 0 : i32
    %c0_i32_1 = arith.constant 0 : i32
    return %c0_i32, %c0_i32_0 : i32, i32
  }
  func.func @transform_4(%arg0: i32) -> (i32, i32) {
    %c0_i32 = arith.constant 0 : i32
    %c0_i32_0 = arith.constant 0 : i32
    %c0_i32_1 = arith.constant 0 : i32
    return %c0_i32, %c0_i32_0 : i32, i32
  }
  func.func @transform_5(%arg0: i32) -> (i32, i32) {
    %c0_i32 = arith.constant 0 : i32
    %c0_i32_0 = arith.constant 0 : i32
    %c0_i32_1 = arith.constant 0 : i32
    return %c0_i32, %c0_i32_0 : i32, i32
  }
  func.func @transform_6(%arg0: i32) -> (i32, i32) {
    %c0_i32 = arith.constant 0 : i32
    %c0_i32_0 = arith.constant 0 : i32
    %c0_i32_1 = arith.constant 0 : i32
    return %c0_i32, %c0_i32_0 : i32, i32
  }
  func.func @transform_7(%arg0: i32) -> (i32, i32) {
    %c0_i32 = arith.constant 0 : i32
    %c0_i32_0 = arith.constant 0 : i32
    return %arg0, %c0_i32 : i32, i32
  }
  func.func @transform_8(%arg0: i32) -> (i32, i32) {
    %c0_i32 = arith.constant 0 : i32
    %c0_i32_0 = arith.constant 0 : i32
    return %arg0, %c0_i32 : i32, i32
  }
}

module attributes {stable_mosaic.version = 11 : i64} {
  func.func @rnn_cell_kernel(%arg0: i32, %arg1: memref<8x128xf32, #tpu.memory_space<vmem>>, %arg2: memref<8x128xf32, #tpu.memory_space<vmem>>, %arg3: memref<128x128xf32, #tpu.memory_space<vmem>>, %arg4: memref<128x128xf32, #tpu.memory_space<vmem>>, %arg5: memref<8x128xf32, #tpu.memory_space<vmem>>, %arg6: memref<128x128xf32, #tpu.memory_space<vmem>>, %arg7: memref<1x128xf32, #tpu.memory_space<vmem>>, %arg8: memref<8x128xf32, #tpu.memory_space<vmem>>, %arg9: memref<8x128xf32, #tpu.memory_space<vmem>>) attributes {dimension_semantics = [#tpu.dimension_semantics<parallel>], iteration_bounds = array<i64: 1>, scalar_prefetch = 0 : i64, scratch_operands = 0 : i64, tpu.core_type = #tpu.core_type<tc>, window_params = [{transform_indices = @transform_0, window_bounds = array<i64: 8, 128>}, {transform_indices = @transform_1, window_bounds = array<i64: 8, 128>}, {pipeline_mode = #tpu.pipeline_mode<synchronous>, transform_indices = @transform_2, window_bounds = array<i64: 128, 128>}, {pipeline_mode = #tpu.pipeline_mode<synchronous>, transform_indices = @transform_3, window_bounds = array<i64: 128, 128>}, {pipeline_mode = #tpu.pipeline_mode<synchronous>, transform_indices = @transform_4, window_bounds = array<i64: 8, 128>}, {pipeline_mode = #tpu.pipeline_mode<synchronous>, transform_indices = @transform_5, window_bounds = array<i64: 128, 128>}, {pipeline_mode = #tpu.pipeline_mode<synchronous>, transform_indices = @transform_6, window_bounds = array<i64: 1, 128>}, {transform_indices = @transform_7, window_bounds = array<i64: 8, 128>}, {transform_indices = @transform_8, window_bounds = array<i64: 8, 128>}]} {
    %c0 = arith.constant 0 : index
    %c0_0 = arith.constant 0 : index
    %0 = vector.load %arg1[%c0, %c0_0] : memref<8x128xf32, #tpu.memory_space<vmem>>, vector<8x128xf32>
    %c0_1 = arith.constant 0 : index
    %c0_2 = arith.constant 0 : index
    %1 = vector.load %arg3[%c0_1, %c0_2] : memref<128x128xf32, #tpu.memory_space<vmem>>, vector<128x128xf32>
    %cst = arith.constant dense<0.000000e+00> : vector<8x128xf32>
    %2 = tpu.matmul %0, %1, %cst {dimension_numbers = #tpu.dot_dimension_numbers<[1], [0], [0], [1], [0, 0, 1, 1], [], []>, precision = #tpu.contract_precision<fp32>} : vector<8x128xf32>, vector<128x128xf32>, vector<8x128xf32> -> vector<8x128xf32>
    %c0_3 = arith.constant 0 : index
    %c0_4 = arith.constant 0 : index
    %3 = vector.load %arg2[%c0_3, %c0_4] : memref<8x128xf32, #tpu.memory_space<vmem>>, vector<8x128xf32>
    %c0_5 = arith.constant 0 : index
    %c0_6 = arith.constant 0 : index
    %4 = vector.load %arg4[%c0_5, %c0_6] : memref<128x128xf32, #tpu.memory_space<vmem>>, vector<128x128xf32>
    %cst_7 = arith.constant dense<0.000000e+00> : vector<8x128xf32>
    %5 = tpu.matmul %3, %4, %cst_7 {dimension_numbers = #tpu.dot_dimension_numbers<[1], [0], [0], [1], [0, 0, 1, 1], [], []>, precision = #tpu.contract_precision<fp32>} : vector<8x128xf32>, vector<128x128xf32>, vector<8x128xf32> -> vector<8x128xf32>
    %6 = arith.addf %2, %5 : vector<8x128xf32>
    %c0_8 = arith.constant 0 : index
    %c0_9 = arith.constant 0 : index
    %7 = vector.load %arg5[%c0_8, %c0_9] : memref<8x128xf32, #tpu.memory_space<vmem>>, vector<1x128xf32>
    %8 = vector.broadcast %7 : vector<1x128xf32> to vector<8x128xf32>
    %9 = arith.addf %6, %8 : vector<8x128xf32>
    %cst_10 = arith.constant dense<0.000000e+00> : vector<8xf32>
    %10 = vector.multi_reduction <add>, %9, %cst_10 [1] : vector<8x128xf32> to vector<8xf32>
    %11 = vector.shape_cast %10 : vector<8xf32> to vector<8x1xf32>
    %12 = arith.mulf %9, %9 : vector<8x128xf32>
    %cst_11 = arith.constant dense<0.000000e+00> : vector<8xf32>
    %13 = vector.multi_reduction <add>, %12, %cst_11 [1] : vector<8x128xf32> to vector<8xf32>
    %14 = vector.shape_cast %13 : vector<8xf32> to vector<8x1xf32>
    %cst_12 = arith.constant 3.125000e-02 : f32
    %15 = vector.broadcast %cst_12 : f32 to vector<8x1xf32>
    %16 = arith.mulf %11, %15 : vector<8x1xf32>
    %cst_13 = arith.constant 3.125000e-02 : f32
    %17 = vector.broadcast %cst_13 : f32 to vector<8x1xf32>
    %18 = arith.mulf %14, %17 : vector<8x1xf32>
    %19 = arith.mulf %16, %16 : vector<8x1xf32>
    %20 = arith.subf %18, %19 : vector<8x1xf32>
    %21 = vector.broadcast %16 : vector<8x1xf32> to vector<8x128xf32>
    %22 = arith.subf %9, %21 : vector<8x128xf32>
    %cst_14 = arith.constant 9.99999974E-6 : f32
    %23 = vector.broadcast %cst_14 : f32 to vector<8x1xf32>
    %24 = arith.addf %20, %23 : vector<8x1xf32>
    %25 = math.rsqrt %24 : vector<8x1xf32>
    %26 = vector.broadcast %25 : vector<8x1xf32> to vector<8x128xf32>
    %27 = arith.mulf %22, %26 : vector<8x128xf32>
    %c1 = arith.constant 1 : index
    %c0_15 = arith.constant 0 : index
    %28 = vector.load %arg5[%c1, %c0_15] : memref<8x128xf32, #tpu.memory_space<vmem>>, vector<1x128xf32>
    %29 = vector.broadcast %28 : vector<1x128xf32> to vector<8x128xf32>
    %30 = arith.mulf %27, %29 : vector<8x128xf32>
    %c2 = arith.constant 2 : index
    %c0_16 = arith.constant 0 : index
    %31 = vector.load %arg5[%c2, %c0_16] : memref<8x128xf32, #tpu.memory_space<vmem>>, vector<1x128xf32>
    %32 = vector.broadcast %31 : vector<1x128xf32> to vector<8x128xf32>
    %33 = arith.addf %30, %32 : vector<8x128xf32>
    %34 = math.tanh %33 : vector<8x128xf32>
    %c0_17 = arith.constant 0 : index
    %c0_18 = arith.constant 0 : index
    %35 = vector.load %arg6[%c0_17, %c0_18] : memref<128x128xf32, #tpu.memory_space<vmem>>, vector<128x128xf32>
    %cst_19 = arith.constant dense<0.000000e+00> : vector<8x128xf32>
    %36 = tpu.matmul %34, %35, %cst_19 {dimension_numbers = #tpu.dot_dimension_numbers<[1], [0], [0], [1], [0, 0, 1, 1], [], []>, precision = #tpu.contract_precision<fp32>} : vector<8x128xf32>, vector<128x128xf32>, vector<8x128xf32> -> vector<8x128xf32>
    %c0_20 = arith.constant 0 : index
    %c0_21 = arith.constant 0 : index
    %37 = vector.load %arg7[%c0_20, %c0_21] : memref<1x128xf32, #tpu.memory_space<vmem>>, vector<1x128xf32>
    %38 = vector.broadcast %37 : vector<1x128xf32> to vector<8x128xf32>
    %39 = arith.addf %36, %38 : vector<8x128xf32>
    %c0_22 = arith.constant 0 : index
    %c0_23 = arith.constant 0 : index
    %40 = vector.load %arg8[%c0_22, %c0_23] : memref<8x128xf32, #tpu.memory_space<vmem>>, vector<8x128xf32>
    tpu.vector_store %arg8[%c0_22, %c0_23], %39 {strides = array<i32>} : memref<8x128xf32, #tpu.memory_space<vmem>>, vector<8x128xf32>,
    %c0_24 = arith.constant 0 : index
    %c0_25 = arith.constant 0 : index
    %41 = vector.load %arg9[%c0_24, %c0_25] : memref<8x128xf32, #tpu.memory_space<vmem>>, vector<8x128xf32>
    tpu.vector_store %arg9[%c0_24, %c0_25], %34 {strides = array<i32>} : memref<8x128xf32, #tpu.memory_space<vmem>>, vector<8x128xf32>,
    return
  }
  func.func @transform_0(%arg0: i32) -> (i32, i32) {
    %c0_i32 = arith.constant 0 : i32
    %c0_i32_0 = arith.constant 0 : i32
    return %arg0, %c0_i32 : i32, i32
  }
  func.func @transform_1(%arg0: i32) -> (i32, i32) {
    %c0_i32 = arith.constant 0 : i32
    %c0_i32_0 = arith.constant 0 : i32
    return %arg0, %c0_i32 : i32, i32
  }
  func.func @transform_2(%arg0: i32) -> (i32, i32) {
    %c0_i32 = arith.constant 0 : i32
    %c0_i32_0 = arith.constant 0 : i32
    %c0_i32_1 = arith.constant 0 : i32
    return %c0_i32, %c0_i32_0 : i32, i32
  }
  func.func @transform_3(%arg0: i32) -> (i32, i32) {
    %c0_i32 = arith.constant 0 : i32
    %c0_i32_0 = arith.constant 0 : i32
    %c0_i32_1 = arith.constant 0 : i32
    return %c0_i32, %c0_i32_0 : i32, i32
  }
  func.func @transform_4(%arg0: i32) -> (i32, i32) {
    %c0_i32 = arith.constant 0 : i32
    %c0_i32_0 = arith.constant 0 : i32
    %c0_i32_1 = arith.constant 0 : i32
    return %c0_i32, %c0_i32_0 : i32, i32
  }
  func.func @transform_5(%arg0: i32) -> (i32, i32) {
    %c0_i32 = arith.constant 0 : i32
    %c0_i32_0 = arith.constant 0 : i32
    %c0_i32_1 = arith.constant 0 : i32
    return %c0_i32, %c0_i32_0 : i32, i32
  }
  func.func @transform_6(%arg0: i32) -> (i32, i32) {
    %c0_i32 = arith.constant 0 : i32
    %c0_i32_0 = arith.constant 0 : i32
    %c0_i32_1 = arith.constant 0 : i32
    return %c0_i32, %c0_i32_0 : i32, i32
  }
  func.func @transform_7(%arg0: i32) -> (i32, i32) {
    %c0_i32 = arith.constant 0 : i32
    %c0_i32_0 = arith.constant 0 : i32
    return %arg0, %c0_i32 : i32, i32
  }
  func.func @transform_8(%arg0: i32) -> (i32, i32) {
    %c0_i32 = arith.constant 0 : i32
    %c0_i32_0 = arith.constant 0 : i32
    return %arg0, %c0_i32 : i32, i32
  }
}

</mosaic_0001>

<bundles_post_ra>
// kernel: tpu_custom_call.1
= control target key start
LH: loop header
LB: loop body
LE: loop exit
PB: predicated region body
PF: predicated region fallthrough
CT: control target
= control target key end

     0   :  { %14 = vsyncpa [#allocation3], 0  ;;  %s2294_s0 = inlined_call_operand.hbm [shape: f32[8,128], index: 0, kind: input, shape index: {}]   ;;  %s2295_s1 = inlined_call_operand.hbm [shape: f32[8,128], index: 1, kind: input, shape index: {}]   ;;  %s2296_s2 = inlined_call_operand.hbm [shape: f32[128,128], index: 2, kind: input, shape index: {}]   ;;  %s2297_s3 = inlined_call_operand.hbm [shape: f32[128,128], index: 3, kind: input, shape index: {}]   ;;  %s2298_s4 = inlined_call_operand.hbm [shape: f32[8,128], index: 4, kind: input, shape index: {}]   ;;  %s2299_s5 = inlined_call_operand.hbm [shape: f32[128,128], index: 5, kind: input, shape index: {}]   ;;  %s2300_s6 = inlined_call_operand.vmem [shape: f32[1,128], index: 6, kind: input, shape index: {}]   ;;  %s2301_s7 = inlined_call_operand.hbm [shape: f32[8,128], index: 7, kind: output, shape index: {0}]   ;;  %s2302_s8 = inlined_call_operand.hbm [shape: f32[8,128], index: 8, kind: output, shape index: {1}]  }
   0x1   :  { %15 = vsyncpa [#allocation6], 0 }
   0x2   :  { %16 = vsyncpa [#allocation9], 0 }
   0x3   :  { %17 = vsyncpa [#allocation12], 0 }
   0x4   :  { %18 = vsyncpa [#allocation4], 0  ;;  %s36_s29 = sshll.u32 %s2295_s1, 4  ;;  %s37_s29 = int_to_ptr.hbm [resolvable:$true] %s36_s29 }
   0x5   :  { %19 = vsyncpa [#allocation15], 0  ;;  %s1487_s30 = smov [#allocation5]   ;;  %s59_s12 = sshll.u32 %s2297_s3, 4  ;;  %s60_s12 = int_to_ptr.hbm [resolvable:$true] %s59_s12 }
   0x6   :  { %s38_s9 = sshll.u32 %s1487_s30, 4  ;;  %s1488_s13 = smov [#allocation8]   ;;  %s39_s9 = int_to_ptr.vmem [resolvable:$true] %s38_s9 }
   0x7   :  { %41 = dma.hbm_to_vmem [thread:$0]  %s37_s29, 128, %s39_s9, [#allocation6]  }
   0x8   :  { %s61_s14 = sshll.u32 %s1488_s13, 4  ;;  %s25_s17 = sshll.u32 %s2294_s0, 4  ;;  %s62_s14 = int_to_ptr.vmem [resolvable:$true] %s61_s14  ;;  %s26_s17 = int_to_ptr.hbm [resolvable:$true] %s25_s17 }
   0x9   :  { %s1489_s1 = smov 128   ;;  %s1490_s18 = smov 8  }
   0xa   :  { %67 = dma.hbm_to_vmem [thread:$0]  %s60_s12, 2048, %s62_s14, [#allocation9], %s1489_s1, %s1489_s1, %s1490_s18  }
   0xb   :  { %s46_s21 = sshll.u32 %s2296_s2, 4  ;;  %s1491_s22 = smov [#allocation2]   ;;  %s47_s21 = int_to_ptr.hbm [resolvable:$true] %s46_s21 }
   0xc   :  { %s27_s23 = sshll.u32 %s1491_s22, 4  ;;  %s1492_s3 = smov [#allocation7]   ;;  %s28_s23 = int_to_ptr.vmem [resolvable:$true] %s27_s23 }
   0xd   :  { %30 = dma.hbm_to_vmem [thread:$0]  %s26_s17, 128, %s28_s23, [#allocation3]  }
   0xe   :  { %s48_s24 = sshll.u32 %s1492_s3, 4  ;;  %s73_s0 = sshll.u32 %s2298_s4, 4  ;;  %s49_s24 = int_to_ptr.vmem [resolvable:$true] %s48_s24  ;;  %s74_s0 = int_to_ptr.hbm [resolvable:$true] %s73_s0 }
   0xf   :  { %54 = dma.hbm_to_vmem [thread:$0]  %s47_s21, 2048, %s49_s24, [#allocation6], %s1489_s1, %s1489_s1, %s1490_s18  }
  0x10   :  { %s83_s29 = sshll.u32 %s2299_s5, 4  ;;  %s1493_s30 = smov [#allocation10]   ;;  %s84_s29 = int_to_ptr.hbm [resolvable:$true] %s83_s29 }
  0x11   :  { %s75_s2 = sshll.u32 %s1493_s30, 4  ;;  %s1494_s9 = smov [#allocation11]   ;;  %s76_s2 = int_to_ptr.vmem [resolvable:$true] %s75_s2 }
  0x12   :  { %78 = dma.hbm_to_vmem [thread:$0]  %s74_s0, 128, %s76_s2, [#allocation9]  }
  0x13   :  { %s85_s10 = sshll.u32 %s1494_s9, 4  ;;  %s86_s10 = int_to_ptr.vmem [resolvable:$true] %s85_s10 }
  0x14   :  { %91 = dma.hbm_to_vmem [thread:$0]  %s84_s29, 2048, %s86_s10, [#allocation12], %s1489_s1, %s1489_s1, %s1490_s18  }
  0x15   :  { %1475 = dma.done.wait [#allocation3], 128  }
  0x16   :  { %1476 = vsyncadd [#allocation3], 4294967168 }
  0x17   :  { %1477 = dma.done.wait [#allocation6], 2176  }
  0x18   :  { %1478 = vsyncadd [#allocation6], 4294965120 }
  0x19   :  { %1479 = dma.done.wait [#allocation9], 2176  }
  0x1a   :  { %1480 = vsyncadd [#allocation9], 4294965120 }
  0x1b   :  { %1481 = dma.done.wait [#allocation12], 2048  }
  0x1c   :  { %1482 = vsyncadd [#allocation12], 4294965248  ;;  %v151_v0 = vld [vmem:[#allocation8 + $0x78] sm:$0xff]  ;;  %v150_v1 = vld [vmem:[#allocation8 + $0x70] sm:$0xff]  ;;  %s1495_s4 = smov [#allocation14]   ;;  %s1247_s13 = sshll.u32 %s2302_s8, 4  ;;  %s1248_s13 = int_to_ptr.hbm [resolvable:$true] %s1247_s13 }
  0x1d   :  { %v149_v2 = vld [vmem:[#allocation8 + $0x68] sm:$0xff]  ;;  %v1560_v3 = vand.u32 4294901760, %v151_v0  ;;  %v1562_v4 = vand.u32 4294901760, %v150_v1  ;;  %v148_v6 = vld [vmem:[#allocation8 + $0x60] sm:$0xff]  ;;  %v147_v7 = vld [vmem:[#allocation8 + $0x58] sm:$0xff]  ;;  %s1245_s5 = sshll.u32 %s1495_s4, 4  ;;  %s1246_s5 = int_to_ptr.vmem [resolvable:$true] %s1245_s5 }
  0x1e   :  { %v1564_v5 = vand.u32 4294901760, %v149_v2  ;;  %v146_v8 = vld [vmem:[#allocation8 + $0x50] sm:$0xff]  ;;  %v1566_v9 = vand.u32 4294901760, %v148_v6  ;;  %v1568_v10 = vand.u32 4294901760, %v147_v7  ;;  %v145_v12 = vld [vmem:[#allocation8 + $0x48] sm:$0xff]  ;;  %v144_v13 = vld [vmem:[#allocation8 + $0x40] sm:$0xff] }
  0x1f   :  { %v1570_v11 = vand.u32 4294901760, %v146_v8  ;;  %153 = vmatpush.msra.mxu0 %v1560_v3  ;;  %v1574_v14 = vsub.f32 %v151_v0, %v1560_v3  ;;  %v1577_v15 = vsub.f32 %v150_v1, %v1562_v4  ;;  %349 = vmatpush.msra.mxu3 %v1560_v3  ;;  %v1583_v17 = vand.u32 4294901760, %v145_v12  ;;  %v143_v18 = vld [vmem:[#allocation8 + $0x38] sm:$0xff]  ;;  %v142_v26 = vld [vmem:[#allocation8 + $0x30] sm:$0xff]  ;;  %v141_v34 = vld [vmem:[#allocation8 + $0x28] sm:$0xff]  ;;  %s1496_s16 = smov [#allocation13]  }
  0x20   :  { %v1581_v16 = vsub.f32 %v149_v2, %v1564_v5  ;;  %v1586_v19 = vsub.f32 %v148_v6, %v1566_v9  ;;  %v1589_v20 = vsub.f32 %v147_v7, %v1568_v10  ;;  %v1599_v25 = vand.u32 4294901760, %v144_v13  ;;  %v140_v42 = vld [vmem:[#allocation8 + $0x20] sm:$0xff]  ;;  %v139_v48 = vld [vmem:[#allocation8 + $0x18] sm:$0xff]  ;;  %v138_v54 = vld [vmem:[#allocation8 + $0x10] sm:$0xff]  ;;  %s1234_s17 = sshll.u32 %s1496_s16, 4  ;;  %s1236_s18 = sshll.u32 %s2301_s7, 4  ;;  %s1235_s17 = int_to_ptr.vmem [resolvable:$true] %s1234_s17  ;;  %s1237_s18 = int_to_ptr.hbm [resolvable:$true] %s1236_s18 }
  0x21   :  { %v1592_v21 = vsub.f32 %v146_v8, %v1570_v11  ;;  %155 = vmatpush.msra.mxu0 %v1562_v4  ;;  %296 = vmatpush.msra.mxu2 %v1574_v14  ;;  %v195_v22 = vand.u32 4294901760, %v1574_v14  ;;  %v2318_v23 = vand.u32 4294901760, %v1577_v15  ;;  %v1603_v28 = vand.u32 4294901760, %v143_v18  ;;  %v134_v59 = vld [vmem:[#allocation7 + $0x78] sm:$0xff]  ;;  %v137_v61 = vld [vmem:[#allocation8 + $0x8] sm:$0xff]  ;;  %v136_v2 = vld [vmem:[#allocation8] sm:$0xff] }
  0x22   :  { %v2316_v24 = vand.u32 4294901760, %v1581_v16  ;;  %351 = vmatpush.msra.mxu3 %v1562_v4  ;;  %v2314_v27 = vand.u32 4294901760, %v1586_v19  ;;  %v1606_v29 = vsub.f32 %v145_v12, %v1583_v17  ;;  %v2312_v33 = vand.u32 4294901760, %v1589_v20  ;;  %v133_v6 = vld [vmem:[#allocation7 + $0x70] sm:$0xff] }
  0x23   :  { %157 = vmatpush.msra.mxu0 %v1564_v5  ;;  %299 = vmatpush.msra.mxu2 %v1577_v15  ;;  %v196_v30 = vsub.f32 %v1574_v14, %v195_v22  ;;  %v202_v31 = vsub.f32 %v1577_v15, %v2318_v23  ;;  %v1621_v35 = vand.u32 4294901760, %v142_v26  ;;  %v2310_v36 = vand.u32 4294901760, %v1592_v21 }
  0x24   :  { %v208_v32 = vsub.f32 %v1581_v16, %v2316_v24  ;;  %353 = vmatpush.msra.mxu3 %v1564_v5  ;;  %v214_v39 = vsub.f32 %v1586_v19, %v2314_v27  ;;  %v1630_v40 = vsub.f32 %v144_v13, %v1599_v25  ;;  %v1633_v41 = vand.u32 4294901760, %v141_v34 }
  0x25   :  { %159 = vmatpush.msra.mxu0 %v1566_v9  ;;  %v197_v37 = vand.u32 4294901760, %v196_v30  ;;  %302 = vmatpush.msra.mxu2 %v1581_v16  ;;  %v203_v38 = vand.u32 4294901760, %v202_v31  ;;  %v220_v44 = vsub.f32 %v1589_v20, %v2312_v33  ;;  %v2309_v45 = vand.u32 4294901760, %v1606_v29 }
  0x26   :  { %355 = vmatpush.msra.mxu3 %v1566_v9  ;;  %v209_v43 = vand.u32 4294901760, %v208_v32  ;;  %v1641_v46 = vsub.f32 %v143_v18, %v1603_v28  ;;  %v226_v47 = vsub.f32 %v1592_v21, %v2310_v36  ;;  %v215_v49 = vand.u32 4294901760, %v214_v39  ;;  %v132_v32 = vld [vmem:[#allocation7 + $0x68] sm:$0xff] }
  0x27   :  { %161 = vmatpush.msra.mxu0 %v1568_v10  ;;  %198 = vmatpush.msra.mxu1 %v197_v37  ;;  %v1649_v50 = vand.u32 4294901760, %v140_v42  ;;  %v2308_v51 = vand.u32 4294901760, %v1630_v40  ;;  %v1653_v52 = vsub.f32 %v142_v26, %v1621_v35  ;;  %v1658_v53 = vsub.f32 %v141_v34, %v1633_v41 }
  0x28   :  { %305 = vmatpush.msra.mxu2 %v1586_v19  ;;  %357 = vmatpush.msra.mxu3 %v1568_v10  ;;  %v221_v55 = vand.u32 4294901760, %v220_v44  ;;  %v232_v56 = vsub.f32 %v1606_v29, %v2309_v45  ;;  %v1664_v57 = vand.u32 4294901760, %v139_v48  ;;  %v2307_v58 = vand.u32 4294901760, %v1641_v46  ;;  %v131_v44 = vld [vmem:[#allocation7 + $0x60] sm:$0xff] }
  0x29   :  { %163 = vmatpush.msra.mxu0 %v1570_v11  ;;  %204 = vmatpush.msra.mxu1 %v203_v38  ;;  %v227_v60 = vand.u32 4294901760, %v226_v47  ;;  %v238_v62 = vsub.f32 %v1630_v40, %v2308_v51  ;;  %v1673_v63 = vand.u32 4294901760, %v138_v54  ;;  %v2305_v0 = vand.u32 4294901760, %v1653_v52  ;;  %v127_v45 = vld [vmem:[#allocation7 + $0x40] sm:$0xff] }
  0x2a   :  { %308 = vmatpush.msra.mxu2 %v1589_v20  ;;  %359 = vmatpush.msra.mxu3 %v1570_v11  ;;  %v1677_v1 = vsub.f32 %v140_v42, %v1649_v50  ;;  %v2304_v7 = vand.u32 4294901760, %v1658_v53  ;;  %v1682_v8 = vand.u32 4294901760, %v134_v59  ;;  %v233_v12 = vand.u32 4294901760, %v232_v56 }
  0x2b   :  { %165 = vmatpush.msra.mxu0 %v1583_v17  ;;  %210 = vmatpush.msra.mxu1 %v209_v43  ;;  %v244_v13 = vsub.f32 %v1641_v46, %v2307_v58  ;;  %v1688_v18 = vand.u32 4294901760, %v137_v61  ;;  %v1691_v26 = vsub.f32 %v139_v48, %v1664_v57  ;;  %v1695_v30 = vand.u32 4294901760, %v136_v2 }
  0x2c   :  { %311 = vmatpush.msra.mxu2 %v1592_v21  ;;  %361 = vmatpush.msra.mxu3 %v1583_v17  ;;  %v1697_v31 = vand.u32 4294901760, %v133_v6  ;;  %v239_v34 = vand.u32 4294901760, %v238_v62  ;;  %v250_v37 = vsub.f32 %v1653_v52, %v2305_v0  ;;  %v2303_v38 = vand.u32 4294901760, %v1677_v1 }
  0x2d   :  { %167 = vmatpush.msra.mxu0 %v1599_v25  ;;  %216 = vmatpush.msra.mxu1 %v215_v49  ;;  %2322 = vst [vmem:[#allocation22_spill] sm:$0xff] %v1695_v30  ;;  %v1705_v39 = vsub.f32 %v138_v54, %v1673_v63  ;;  %v256_v42 = vsub.f32 %v1658_v53, %v2304_v7  ;;  %v245_v47 = vand.u32 4294901760, %v244_v13  ;;  %v2306_v48 = vand.u32 4294901760, %v1691_v26  ;;  %v129_v13 = vld [vmem:[#allocation7 + $0x50] sm:$0xff] }
  0x2e   :  { %314 = vmatpush.msra.mxu2 %v1606_v29  ;;  %363 = vmatpush.msra.mxu3 %v1599_v25  ;;  %v1713_v43 = vsub.f32 %v134_v59, %v1682_v8  ;;  %v1718_v49 = vsub.f32 %v137_v61, %v1688_v18  ;;  %v1720_v54 = vand.u32 4294901760, %v132_v32  ;;  %v1728_v56 = vsub.f32 %v133_v6, %v1697_v31  ;;  %v130_v59 = vld [vmem:[#allocation7 + $0x58] sm:$0xff] }
  0x2f   :  { %169 = vmatpush.msra.mxu0 %v1603_v28  ;;  %222 = vmatpush.msra.mxu1 %v221_v55  ;;  %v1725_v55 = vsub.f32 %v136_v2, %v1695_v30  ;;  %v262_v61 = vsub.f32 %v1677_v1, %v2303_v38  ;;  %v2311_v62 = vand.u32 4294901760, %v1705_v39  ;;  %v257_v2 = vand.u32 4294901760, %v256_v42  ;;  %v128_v42 = vld [vmem:[#allocation7 + $0x48] sm:$0xff] }
  0x30   :  { %317 = vmatpush.msra.mxu2 %v1630_v40  ;;  %365 = vmatpush.msra.mxu3 %v1603_v28  ;;  %v2313_v6 = vand.u32 4294901760, %v1713_v43  ;;  %v1746_v38 = vsub.f32 %v132_v32, %v1720_v54  ;;  %v1748_v7 = vand.u32 4294901760, %v130_v59  ;;  %v1761_v51 = vand.u32 4294901760, %v129_v13 }
  0x31   :  { %171 = vmatpush.msra.mxu0 %v1621_v35  ;;  %228 = vmatpush.msra.mxu1 %v227_v60  ;;  %v251_v60 = vand.u32 4294901760, %v250_v37  ;;  %v2315_v37 = vand.u32 4294901760, %v1718_v49  ;;  %v2319_v0 = vand.u32 4294901760, %v1725_v55  ;;  %v274_v32 = vsub.f32 %v1705_v39, %v2311_v62 }
  0x32   :  { %320 = vmatpush.msra.mxu2 %v1641_v46  ;;  %367 = vmatpush.msra.mxu3 %v1621_v35  ;;  %v537_v36 = vsub.f32 %v1713_v43, %v2313_v6  ;;  %v2320_v62 = vand.u32 4294901760, %v1746_v38  ;;  %v1776_v33 = vsub.f32 %v130_v59, %v1748_v7  ;;  %v1783_v27 = vand.u32 4294901760, %v127_v45 }
  0x33   :  { %173 = vmatpush.msra.mxu0 %v1633_v41  ;;  %234 = vmatpush.msra.mxu1 %v233_v12  ;;  %v1735_v12 = vand.u32 4294901760, %v131_v44  ;;  %v286_v59 = vsub.f32 %v1725_v55, %v2319_v0  ;;  %v1791_v24 = vsub.f32 %v129_v13, %v1761_v51  ;;  %v2323_v14 = vand.u32 4294901760, %v1577_v15 }
  0x34   :  { %323 = vmatpush.msra.mxu2 %v1653_v52  ;;  %369 = vmatpush.msra.mxu3 %v1633_v41  ;;  %v549_v0 = vsub.f32 %v1746_v38, %v2320_v62  ;;  %v2325_v15 = vand.u32 4294901760, %v1581_v16  ;;  %v2327_v16 = vand.u32 4294901760, %v1586_v19  ;;  %v2329_v19 = vand.u32 4294901760, %v1589_v20 }
  0x35   :  { %175 = vmatpush.msra.mxu0 %v1649_v50  ;;  %240 = vmatpush.msra.mxu1 %v239_v34  ;;  %v268_v34 = vsub.f32 %v1691_v26, %v2306_v48  ;;  %v263_v48 = vand.u32 4294901760, %v262_v61  ;;  %v1759_v58 = vsub.f32 %v131_v44, %v1735_v12  ;;  %v280_v44 = vsub.f32 %v1718_v49, %v2315_v37 }
  0x36   :  { %326 = vmatpush.msra.mxu2 %v1658_v53  ;;  %371 = vmatpush.msra.mxu3 %v1649_v50  ;;  %v2331_v20 = vand.u32 4294901760, %v1592_v21  ;;  %v2333_v21 = vand.u32 4294901760, %v1606_v29  ;;  %v2335_v29 = vand.u32 4294901760, %v1630_v40  ;;  %v2337_v40 = vand.u32 4294901760, %v1641_v46 }
  0x37   :  { %177 = vmatpush.msra.mxu0 %v1664_v57  ;;  %246 = vmatpush.msra.mxu1 %v245_v47  ;;  %v2317_v47 = vand.u32 4294901760, %v1728_v56  ;;  %v269_v61 = vand.u32 4294901760, %v268_v34  ;;  %v275_v34 = vand.u32 4294901760, %v274_v32  ;;  %v281_v32 = vand.u32 4294901760, %v280_v44 }
  0x38   :  { %329 = vmatpush.msra.mxu2 %v1677_v1  ;;  %373 = vmatpush.msra.mxu3 %v1664_v57  ;;  %v2324_v44 = vand.u32 4294901760, %v1759_v58 }
  0x39   :  { %179 = vmatpush.msra.mxu0 %v1673_v63  ;;  %252 = vmatpush.msra.mxu1 %v251_v60  ;;  %v1768_v60 = vand.u32 4294901760, %v128_v42  ;;  %v543_v6 = vsub.f32 %v1728_v56, %v2317_v47  ;;  %v538_v47 = vand.u32 4294901760, %v537_v36  ;;  %v1810_v36 = vsub.f32 %v127_v45, %v1783_v27 }
  0x3a   :  { %332 = vmatpush.msra.mxu2 %v1691_v26  ;;  %375 = vmatpush.msra.mxu3 %v1673_v63  ;;  %v555_v62 = vsub.f32 %v1759_v58, %v2324_v44 }
  0x3b   :  { %181 = vmatpush.msra.mxu0 %v1688_v18  ;;  %258 = vmatpush.msra.mxu1 %v257_v2  ;;  %v126_v2 = vld [vmem:[#allocation7 + $0x38] sm:$0xff]  ;;  %v1797_v23 = vsub.f32 %v128_v42, %v1768_v60  ;;  %v124_v42 = vld [vmem:[#allocation7 + $0x28] sm:$0xff] }
  0x3c   :  { %335 = vmatpush.msra.mxu2 %v1705_v39  ;;  %377 = vmatpush.msra.mxu3 %v1688_v18  ;;  %v1804_v37 = vand.u32 4294901760, %v126_v2  ;;  %v1829_v13 = vand.u32 4294901760, %v124_v42 }
  0x3d   :  { %183 = vmatpush.msra.mxu0 %v1695_v30  ;;  %264 = vmatpush.msra.mxu1 %v263_v48  ;;  %v125_v48 = vld [vmem:[#allocation7 + $0x30] sm:$0xff] }
  0x3e   :  { %338 = vmatpush.msra.mxu2 %v1718_v49  ;;  %379 = vmatpush.msra.mxu3 %v1695_v30  ;;  %v1817_v30 = vand.u32 4294901760, %v125_v48  ;;  %v1827_v44 = vsub.f32 %v126_v2, %v1804_v37 }
  0x3f   :  { %390 = vmatpush.msrb.mxu0 %v195_v22  ;;  %270 = vmatpush.msra.mxu1 %v269_v61  ;;  %v544_v22 = vand.u32 4294901760, %v543_v6  ;;  %v287_v61 = vand.u32 4294901760, %v286_v59  ;;  %v123_v6 = vld [vmem:[#allocation7 + $0x20] sm:$0xff]  ;;  %v2326_v59 = vand.u32 4294901760, %v1776_v33 }
  0x40   :  { %341 = vmatpush.msra.mxu2 %v1725_v55  ;;  %539 = vmatpush.msrb.mxu3 %v538_v47  ;;  %v1839_v2 = vsub.f32 %v125_v48, %v1817_v30  ;;  %v1841_v45 = vand.u32 4294901760, %v123_v6  ;;  %v1852_v48 = vsub.f32 %v124_v42, %v1829_v13 }
  0x41   :  { %394 = vmatpush.msrb.mxu0 %v2323_v14  ;;  %276 = vmatpush.msra.mxu1 %v275_v34  ;;  %v550_v34 = vand.u32 4294901760, %v549_v0  ;;  %v561_v14 = vsub.f32 %v1776_v33, %v2326_v59  ;;  %v556_v0 = vand.u32 4294901760, %v555_v62 }
  0x42   :  { %494 = vmatpush.msrb.mxu2 %v1682_v8  ;;  %545 = vmatpush.msrb.mxu3 %v544_v22  ;;  %v2330_v22 = vand.u32 4294901760, %v1797_v23  ;;  %v1865_v42 = vsub.f32 %v123_v6, %v1841_v45 }
  0x43   :  { %398 = vmatpush.msrb.mxu0 %v2325_v15  ;;  %282 = vmatpush.msra.mxu1 %v281_v32  ;;  %v122_v15 = vld [vmem:[#allocation7 + $0x18] sm:$0xff]  ;;  %v2328_v32 = vand.u32 4294901760, %v1791_v24  ;;  %v562_v62 = vand.u32 4294901760, %v561_v14 }
  0x44   :  { %496 = vmatpush.msrb.mxu2 %v1697_v31  ;;  %551 = vmatpush.msrb.mxu3 %v550_v34  ;;  %v1854_v47 = vand.u32 4294901760, %v122_v15 }
  0x45   :  { %402 = vmatpush.msrb.mxu0 %v2327_v16  ;;  %288 = vmatpush.msra.mxu1 %v287_v61  ;;  %v567_v59 = vsub.f32 %v1791_v24, %v2328_v32  ;;  %v573_v61 = vsub.f32 %v1797_v23, %v2330_v22  ;;  %v135_v16 = vld [vmem:[#allocation5] sm:$0xff]  ;;  %v121_v22 = vld [vmem:[#allocation7 + $0x10] sm:$0xff] }
  0x46   :  { %498 = vmatpush.msrb.mxu2 %v1720_v54  ;;  %557 = vmatpush.msrb.mxu3 %v556_v0  ;;  %v1867_v32 = vand.u32 4294901760, %v135_v16  ;;  %v2334_v0 = vand.u32 4294901760, %v1827_v44  ;;  %v1877_v6 = vand.u32 4294901760, %v121_v22  ;;  %v1880_v14 = vsub.f32 %v122_v15, %v1854_v47 }
  0x47   :  { %406 = vmatpush.msrb.mxu0 %v2329_v19  ;;  %457 = vmatpush.msrb.mxu1 %v1560_v3  ;;  %v2332_v3 = vand.u32 4294901760, %v1810_v36  ;;  %v568_v34 = vand.u32 4294901760, %v567_v59 }
  0x48   :  { %500 = vmatpush.msrb.mxu2 %v1735_v12  ;;  %563 = vmatpush.msrb.mxu3 %v562_v62  ;;  %v585_v59 = vsub.f32 %v1827_v44, %v2334_v0  ;;  %v1891_v0 = vsub.f32 %v135_v16, %v1867_v32  ;;  %v1904_v16 = vsub.f32 %v121_v22, %v1877_v6 }
  0x49   :  { %410 = vmatpush.msrb.mxu0 %v2331_v20  ;;  %459 = vmatpush.msrb.mxu1 %v1562_v4  ;;  %v579_v19 = vsub.f32 %v1810_v36, %v2332_v3  ;;  %v574_v4 = vand.u32 4294901760, %v573_v61  ;;  %v120_v20 = vld [vmem:[#allocation7 + $0x8] sm:$0xff]  ;;  %v2336_v61 = vand.u32 4294901760, %v1839_v2  ;;  %v119_v3 = vld [vmem:[#allocation7] sm:$0xff] }
  0x4a   :  { %502 = vmatpush.msrb.mxu2 %v1748_v7  ;;  %569 = vmatpush.msrb.mxu3 %v568_v34  ;;  %v1893_v15 = vand.u32 4294901760, %v120_v20  ;;  %v1909_v46 = vand.u32 4294901760, %v119_v3 }
  0x4b   :  { %414 = vmatpush.msrb.mxu0 %v2333_v21  ;;  %461 = vmatpush.msrb.mxu1 %v1564_v5  ;;  %v580_v5 = vand.u32 4294901760, %v579_v19  ;;  %v591_v62 = vsub.f32 %v1839_v2, %v2336_v61  ;;  %v602_v21 = vand.u32 4294901760, %v1865_v42  ;;  %v2338_v19 = vand.u32 4294901760, %v1852_v48 }
  0x4c   :  { %504 = vmatpush.msrb.mxu2 %v1761_v51  ;;  %575 = vmatpush.msrb.mxu3 %v574_v4  ;;  %v2339_v61 = vand.u32 4294901760, %v1653_v52  ;;  %v1917_v22 = vsub.f32 %v120_v20, %v1893_v15  ;;  %v2340_v52 = vand.u32 4294901760, %v1658_v53  ;;  %v1931_v53 = vsub.f32 %v119_v3, %v1909_v46 }
  0x4d   :  { %418 = vmatpush.msrb.mxu0 %v2335_v29  ;;  %463 = vmatpush.msrb.mxu1 %v1566_v9  ;;  %v586_v9 = vand.u32 4294901760, %v585_v59  ;;  %v597_v34 = vsub.f32 %v1852_v48, %v2338_v19  ;;  %v608_v29 = vand.u32 4294901760, %v1880_v14  ;;  %v603_v4 = vsub.f32 %v1865_v42, %v602_v21 }
  0x4e   :  { %506 = vmatpush.msrb.mxu2 %v1768_v60  ;;  %581 = vmatpush.msrb.mxu3 %v580_v5  ;;  %v186_v59 = vand.u32 4294901760, %v1891_v0  ;;  %v2341_v19 = vand.u32 4294901760, %v1677_v1  ;;  %v2343_v3 = vand.u32 4294901760, %v1705_v39  ;;  %v2345_v39 = vand.u32 4294901760, %v1725_v55 }
  0x4f   :  { %422 = vmatpush.msrb.mxu0 %v2337_v40  ;;  %465 = vmatpush.msrb.mxu1 %v1568_v10  ;;  %v592_v10 = vand.u32 4294901760, %v591_v62  ;;  %v598_v5 = vand.u32 4294901760, %v597_v34  ;;  %v609_v62 = vsub.f32 %v1880_v14, %v608_v29  ;;  %v614_v40 = vand.u32 4294901760, %v1904_v16 }
  0x50   :  { %508 = vmatpush.msrb.mxu2 %v1783_v27  ;;  %587 = vmatpush.msrb.mxu3 %v586_v9  ;;  %v187_v20 = vsub.f32 %v1891_v0, %v186_v59  ;;  %v620_v9 = vand.u32 4294901760, %v1917_v22 }
  0x51   :  { %426 = vmatpush.msrb.mxu0 %v2339_v61  ;;  %467 = vmatpush.msrb.mxu1 %v1570_v11  ;;  %v118_v11 = vld [vmem:[#allocation2] sm:$0xff]  ;;  %v2342_v61 = vand.u32 4294901760, %v1691_v26  ;;  %v615_v1 = vsub.f32 %v1904_v16, %v614_v40 }
  0x52   :  { %510 = vmatpush.msrb.mxu2 %v1804_v37  ;;  %593 = vmatpush.msrb.mxu3 %v592_v10  ;;  %v1936_v34 = vand.u32 4294901760, %v118_v11  ;;  %v626_v10 = vand.u32 4294901760, %v1931_v53  ;;  %v188_v26 = vand.u32 4294901760, %v187_v20 }
  0x53   :  { %430 = vmatpush.msrb.mxu0 %v2340_v52  ;;  %469 = vmatpush.msrb.mxu1 %v1583_v17  ;;  %v604_v17 = vand.u32 4294901760, %v603_v4  ;;  %v2344_v52 = vand.u32 4294901760, %v1718_v49 }
  0x54   :  { %512 = vmatpush.msrb.mxu2 %v1817_v30  ;;  %599 = vmatpush.msrb.mxu3 %v598_v5  ;;  %v1954_v4 = vsub.f32 %v118_v11, %v1936_v34  ;;  %v627_v5 = vsub.f32 %v1931_v53, %v626_v10 }
  0x55   :  { %434 = vmatpush.msrb.mxu0 %v2341_v19  ;;  %471 = vmatpush.msrb.mxu1 %v1599_v25  ;;  %v610_v25 = vand.u32 4294901760, %v609_v62 }
  0x56   :  { %514 = vmatpush.msrb.mxu2 %v1829_v13  ;;  %605 = vmatpush.msrb.mxu3 %v604_v17  ;;  %v527_v11 = vand.u32 4294901760, %v1954_v4 }
  0x57   :  { %438 = vmatpush.msrb.mxu0 %v2342_v61  ;;  %473 = vmatpush.msrb.mxu1 %v1603_v28  ;;  %v621_v28 = vsub.f32 %v1917_v22, %v620_v9 }
  0x58   :  { %516 = vmatpush.msrb.mxu2 %v1841_v45  ;;  %611 = vmatpush.msrb.mxu3 %v610_v25 }
  0x59   :  { %442 = vmatpush.msrb.mxu0 %v2343_v3  ;;  %475 = vmatpush.msrb.mxu1 %v1621_v35  ;;  %v616_v35 = vand.u32 4294901760, %v615_v1  ;;  %v622_v49 = vand.u32 4294901760, %v621_v28 }
  0x5a   :  { %518 = vmatpush.msrb.mxu2 %v1854_v47  ;;  %189 = vmatmul.f32.vlgmr.msra.gmra.mxu0 %v188_v26 }
  0x5b   :  { %446 = vmatpush.msrb.mxu0 %v2344_v52  ;;  %477 = vmatpush.msrb.mxu1 %v1633_v41  ;;  %v628_v41 = vand.u32 4294901760, %v627_v5 }
  0x5c   :  { %520 = vmatpush.msrb.mxu2 %v1877_v6  ;;  %617 = vmatpush.msrb.mxu3 %v616_v35 }
  0x5d   :  { %450 = vmatpush.msrb.mxu0 %v2345_v39  ;;  %479 = vmatpush.msrb.mxu1 %v1649_v50  ;;  %v528_v50 = vsub.f32 %v1954_v4, %v527_v11  ;;  %v1275_v39 = vld [vmem:[#allocation10] ss:$0 sm:$0xff] }
  0x5e   :  { %522 = vmatpush.msrb.mxu2 %v1893_v15  ;;  %623 = vmatpush.msrb.mxu3 %v622_v49 }
  0x5f   :  { %637 = vmatpush.msra.mxu0 %v1713_v43  ;;  %481 = vmatpush.msrb.mxu1 %v1664_v57  ;;  %v2346_v57 = vand.u32 4294901760, %v1713_v43  ;;  %v529_v55 = vand.u32 4294901760, %v528_v50  ;;  %v2349_v43 = vand.u32 4294901760, %v1746_v38  ;;  %v877_v50 = vld [vmem:[#allocation11 + $0x58] sm:$0xff] }
  0x60   :  { %344 = vmatmul.f32.vlgmr.msra.gmra.mxu2 %v1891_v0  ;;  %383 = vmatmul.f32.vlgmr.msra.gmra.mxu3 %v186_v59  ;;  %v2348_v0 = vld [vmem:[#allocation22_spill] sm:$0xff] }
  0x61   :  { %640 = vmatpush.msra.mxu0 %v1728_v56  ;;  %483 = vmatpush.msrb.mxu1 %v1673_v63  ;;  %v2347_v63 = vand.u32 4294901760, %v1728_v56 }
  0x62   :  { %524 = vmatpush.msrb.mxu2 %v1909_v46  ;;  %629 = vmatpush.msrb.mxu3 %v628_v41 }
  0x63   :  { %643 = vmatpush.msra.mxu0 %v1746_v38  ;;  %485 = vmatpush.msrb.mxu1 %v1688_v18  ;;  %v2350_v18 = vand.u32 4294901760, %v1759_v58 }
  0x64   :  { %731 = vmatpush.msra.mxu2 %v2346_v57  ;;  %290 = vmatmul.f32.vlgmr.msra.gmra.mxu1 %v1867_v32  ;;  %v2119_v57 = vand.u32 4294901760, %v877_v50 }
  0x65   :  { %646 = vmatpush.msra.mxu0 %v1759_v58  ;;  %798 = vmatpush.msra.mxu3 %v1682_v8  ;;  %v2352_v58 = vand.u32 4294901760, %v1791_v24 }
  0x66   :  { %735 = vmatpush.msra.mxu2 %v2347_v63  ;;  %487 = vmatpush.msrb.mxu1 %v2348_v0  ;;  %v876_v63 = vld [vmem:[#allocation11 + $0x50] sm:$0xff] }
  0x67   :  { %649 = vmatpush.msra.mxu0 %v1776_v33  ;;  %800 = vmatpush.msra.mxu3 %v1697_v31  ;;  %v2124_v0 = vand.u32 4294901760, %v876_v63 }
  0x68   :  { %690 = vmatpush.msra.mxu1 %v1682_v8  ;;  %739 = vmatpush.msra.mxu2 %v2349_v43  ;;  %v2351_v8 = vand.u32 4294901760, %v1776_v33  ;;  %v2353_v33 = vand.u32 4294901760, %v1797_v23  ;;  %v875_v43 = vld [vmem:[#allocation11 + $0x48] sm:$0xff] }
  0x69   :  { %530 = vmatmul.f32.vlgmr.msrb.gmra.mxu2 %v529_v55  ;;  %652 = vmatpush.msra.mxu0 %v1791_v24  ;;  %v2355_v24 = vand.u32 4294901760, %v1827_v44  ;;  %v2122_v55 = vsub.f32 %v877_v50, %v2119_v57 }
  0x6a   :  { %692 = vmatpush.msra.mxu1 %v1697_v31  ;;  %743 = vmatpush.msra.mxu2 %v2350_v18  ;;  %v2354_v31 = vand.u32 4294901760, %v1810_v36 }
  0x6b   :  { %802 = vmatpush.msra.mxu3 %v1720_v54  ;;  %452 = vmatmul.f32.vlgmr.msrb.gmra.mxu0 %v1867_v32  ;;  %v953_v18 = vand.u32 4294901760, %v2122_v55 }
  0x6c   :  { %631 = vmatmul.f32.vlgmr.msrb.gmra.mxu3 %v1936_v34  ;;  %655 = vmatpush.msra.mxu0 %v1797_v23  ;;  %v2356_v23 = vand.u32 4294901760, %v1839_v2 }
  0x6d   :  { %694 = vmatpush.msra.mxu1 %v1720_v54  ;;  %747 = vmatpush.msra.mxu2 %v2351_v8  ;;  %v2130_v8 = vsub.f32 %v876_v63, %v2124_v0 }
  0x6e   :  { %804 = vmatpush.msra.mxu3 %v1735_v12  ;;  %489 = vmatmul.f32.vlgmr.msrb.gmra.mxu1 %v1867_v32 }
  0x6f   :  { %658 = vmatpush.msra.mxu0 %v1810_v36  ;;  %696 = vmatpush.msra.mxu1 %v1735_v12  ;;  %v881_v36 = vld [vmem:[#allocation11 + $0x78] sm:$0xff] }
  0x70   :  { %751 = vmatpush.msra.mxu2 %v2352_v58  ;;  %806 = vmatpush.msra.mxu3 %v1748_v7  ;;  %v2132_v58 = vand.u32 4294901760, %v875_v43 }
  0x71   :  { %661 = vmatpush.msra.mxu0 %v1827_v44  ;;  %698 = vmatpush.msra.mxu1 %v1748_v7  ;;  %v879_v44 = vld [vmem:[#allocation11 + $0x68] sm:$0xff] }
  0x72   :  { %755 = vmatpush.msra.mxu2 %v2353_v33  ;;  %808 = vmatpush.msra.mxu3 %v1761_v51  ;;  %v2070_v32 = vand.u32 4294901760, %v879_v44  ;;  %v874_v33 = vld [vmem:[#allocation11 + $0x40] sm:$0xff] }
  0x73   :  { %664 = vmatpush.msra.mxu0 %v1839_v2  ;;  %700 = vmatpush.msra.mxu1 %v1761_v51  ;;  %v2357_v51 = vand.u32 4294901760, %v1852_v48 }
  0x74   :  { %759 = vmatpush.msra.mxu2 %v2354_v31  ;;  %810 = vmatpush.msra.mxu3 %v1768_v60  ;;  %v954_v31 = vsub.f32 %v2122_v55, %v953_v18 }
  0x75   :  { %667 = vmatpush.msra.mxu0 %v1852_v48  ;;  %702 = vmatpush.msra.mxu1 %v1768_v60  ;;  %v878_v48 = vld [vmem:[#allocation11 + $0x60] sm:$0xff] }
  0x76   :  { %763 = vmatpush.msra.mxu2 %v2355_v24  ;;  %812 = vmatpush.msra.mxu3 %v1783_v27  ;;  %v959_v24 = vand.u32 4294901760, %v2130_v8 }
  0x77   :  { %670 = vmatpush.msra.mxu0 %v1865_v42  ;;  %704 = vmatpush.msra.mxu1 %v1783_v27  ;;  %v2072_v42 = vand.u32 4294901760, %v878_v48 }
  0x78   :  { %767 = vmatpush.msra.mxu2 %v2356_v23  ;;  %814 = vmatpush.msra.mxu3 %v1804_v37  ;;  %v2142_v23 = vsub.f32 %v875_v43, %v2132_v58 }
  0x79   :  { %673 = vmatpush.msra.mxu0 %v1880_v14  ;;  %706 = vmatpush.msra.mxu1 %v1804_v37 }
  0x7a   :  { %771 = vmatpush.msra.mxu2 %v2357_v51  ;;  %816 = vmatpush.msra.mxu3 %v1817_v30  ;;  %v2144_v51 = vand.u32 4294901760, %v874_v33 }
  0x7b   :  { %676 = vmatpush.msra.mxu0 %v1904_v16  ;;  %708 = vmatpush.msra.mxu1 %v1817_v30  ;;  %v2086_v16 = vsub.f32 %v878_v48, %v2072_v42 }
  0x7c   :  { %775 = vmatpush.msra.mxu2 %v602_v21  ;;  %818 = vmatpush.msra.mxu3 %v1829_v13 }
  0x7d   :  { %679 = vmatpush.msra.mxu0 %v1917_v22  ;;  %710 = vmatpush.msra.mxu1 %v1829_v13 }
  0x7e   :  { %779 = vmatpush.msra.mxu2 %v608_v29  ;;  %820 = vmatpush.msra.mxu3 %v1841_v45  ;;  %v2081_v29 = vsub.f32 %v879_v44, %v2070_v32  ;;  %v871_v44 = vld [vmem:[#allocation11 + $0x28] sm:$0xff] }
  0x7f   :  { %682 = vmatpush.msra.mxu0 %v1931_v53  ;;  %712 = vmatpush.msra.mxu1 %v1841_v45  ;;  %v880_v45 = vld [vmem:[#allocation11 + $0x70] sm:$0xff] }
  0x80   :  { %783 = vmatpush.msra.mxu2 %v614_v40  ;;  %822 = vmatpush.msra.mxu3 %v1854_v47  ;;  %v2068_v2 = vand.u32 4294901760, %v880_v45  ;;  %v941_v22 = vand.u32 4294901760, %v2081_v29  ;;  %v947_v40 = vand.u32 4294901760, %v2086_v16 }
  0x81   :  { %685 = vmatmul.f32.vlgmr.msra.gmra.mxu0 %v1954_v4  ;;  %714 = vmatpush.msra.mxu1 %v1854_v47  ;;  %v2066_v47 = vand.u32 4294901760, %v881_v36 }
  0x82   :  { %787 = vmatpush.msra.mxu2 %v620_v9  ;;  %824 = vmatpush.msra.mxu3 %v1877_v6  ;;  %v942_v17 = vsub.f32 %v2081_v29, %v941_v22  ;;  %v948_v61 = vsub.f32 %v2086_v16, %v947_v40 }
  0x83   :  { %716 = vmatpush.msra.mxu1 %v1877_v6  ;;  %v2075_v21 = vsub.f32 %v881_v36, %v2066_v47  ;;  %887 = vmatpush.msrb.mxu0 %v2066_v47 }
  0x84   :  { %791 = vmatpush.msra.mxu2 %v626_v10  ;;  %826 = vmatpush.msra.mxu3 %v1893_v15  ;;  %v943_v3 = vand.u32 4294901760, %v942_v17  ;;  %v949_v26 = vand.u32 4294901760, %v948_v61 }
  0x85   :  { %793 = vmatmul.f32.vlgmr.msra.gmra.mxu2 %v1936_v34  ;;  %718 = vmatpush.msra.mxu1 %v1893_v15  ;;  %v2078_v15 = vsub.f32 %v880_v45, %v2068_v2 }
  0x86   :  { %828 = vmatpush.msra.mxu3 %v1909_v46  ;;  %889 = vmatpush.msrb.mxu0 %v2068_v2 }
  0x87   :  { %830 = vmatmul.f32.vlgmr.msra.gmra.mxu3 %v1936_v34  ;;  %720 = vmatpush.msra.mxu1 %v1909_v46  ;;  %v929_v46 = vand.u32 4294901760, %v2075_v21  ;;  %v935_v59 = vand.u32 4294901760, %v2078_v15 }
  0x88   :  { %724 = vmatmul.f32.vlgmr.msra.gmra.mxu1 %v527_v11  ;;  %1083 = vmatpush.msrb.mxu3 %v2066_v47 }
  0x89   :  { %1030 = vmatpush.msrb.mxu2 %v2075_v21  ;;  %v930_v19 = vsub.f32 %v2075_v21, %v929_v46  ;;  %v936_v53 = vsub.f32 %v2078_v15, %v935_v59  ;;  %891 = vmatpush.msrb.mxu0 %v2070_v32 }
  0x8a   :  { %1085 = vmatpush.msrb.mxu3 %v2068_v2 }
  0x8b   :  { %1033 = vmatpush.msrb.mxu2 %v2078_v15  ;;  %v931_v9 = vand.u32 4294901760, %v930_v19  ;;  %v937_v34 = vand.u32 4294901760, %v936_v53  ;;  %893 = vmatpush.msrb.mxu0 %v2072_v42  ;;  %v870_v53 = vld [vmem:[#allocation11 + $0x20] sm:$0xff] }
  0x8c   :  { %1087 = vmatpush.msrb.mxu3 %v2070_v32 }
  0x8d   :  { %1036 = vmatpush.msrb.mxu2 %v2081_v29  ;;  %932 = vmatpush.msrb.mxu1 %v931_v9 }
  0x8e   :  { %1089 = vmatpush.msrb.mxu3 %v2072_v42  ;;  %895 = vmatpush.msrb.mxu0 %v2119_v57 }
  0x8f   :  { %1039 = vmatpush.msrb.mxu2 %v2086_v16  ;;  %938 = vmatpush.msrb.mxu1 %v937_v34  ;;  %v2188_v34 = vand.u32 4294901760, %v870_v53 }
  0x90   :  { %1091 = vmatpush.msrb.mxu3 %v2119_v57  ;;  %897 = vmatpush.msrb.mxu0 %v2124_v0 }
  0x91   :  { %944 = vmatpush.msrb.mxu1 %v943_v3  ;;  %1042 = vmatpush.msrb.mxu2 %v2122_v55 }
  0x92   :  { %1093 = vmatpush.msrb.mxu3 %v2124_v0  ;;  %899 = vmatpush.msrb.mxu0 %v2132_v58 }
  0x93   :  { %950 = vmatpush.msrb.mxu1 %v949_v26  ;;  %1045 = vmatpush.msrb.mxu2 %v2130_v8 }
  0x94   :  { %1095 = vmatpush.msrb.mxu3 %v2132_v58  ;;  %901 = vmatpush.msrb.mxu0 %v2144_v51 }
  0x95   :  { %1048 = vmatpush.msrb.mxu2 %v2142_v23 }
  0x96   :  { %1097 = vmatpush.msrb.mxu3 %v2144_v51 }
  0xd7   :  { %v190_v7 = vpop.f32.mrf.mxu0 }
  0xe1   :  { %v291_v27 = vpop.f32.mrf.mxu1 }
  0xe2   :  { %v292_v30 = vadd.f32 %v291_v27, %v190_v7  ;;  %v873_v27 = vld [vmem:[#allocation11 + $0x38] sm:$0xff]  ;;  %v955_v7 = vand.u32 4294901760, %v954_v31 }
  0xe3   :  { %v345_v38 = vpop.f32.mrf.mxu2  ;;  %v384_v56 = vpop.f32.mrf.mxu3 }
  0xe4   :  { %v346_v54 = vadd.f32 %v345_v38, %v292_v30  ;;  %v960_v30 = vsub.f32 %v2130_v8, %v959_v24  ;;  %v965_v38 = vand.u32 4294901760, %v2142_v23  ;;  %956 = vmatpush.msrb.mxu1 %v955_v7  ;;  %v1277_v8 = vld [vmem:[#allocation10 + $0x2] ss:$0 sm:$0xff] }
  0xe6   :  { %v385_v12 = vadd.f32 %v384_v56, %v346_v54  ;;  %v2154_v54 = vsub.f32 %v874_v33, %v2144_v51  ;;  %v2158_v56 = vand.u32 4294901760, %v873_v27 }
  0xe8   :  { %v453_v37 = vpop.f32.mrf.mxu0  ;;  %1051 = vmatpush.msrb.mxu2 %v2154_v54  ;;  %v2169_v45 = vsub.f32 %v873_v27, %v2158_v56  ;;  %903 = vmatpush.msrb.mxu0 %v2158_v56  ;;  %v866_v27 = vld [vmem:[#allocation11] sm:$0xff] }
  0xe9   :  { %v454_v60 = vadd.f32 %v453_v37, %v385_v12  ;;  %v872_v12 = vld [vmem:[#allocation11 + $0x30] sm:$0xff]  ;;  %v961_v37 = vand.u32 4294901760, %v960_v30  ;;  %1099 = vmatpush.msrb.mxu3 %v2158_v56 }
  0xea   :  { %v2165_v36 = vand.u32 4294901760, %v872_v12  ;;  %v977_v19 = vand.u32 4294901760, %v2169_v45  ;;  %1054 = vmatpush.msrb.mxu2 %v2169_v45 }
  0xeb   :  { %v490_v13 = vpop.f32.mrf.mxu1  ;;  %962 = vmatpush.msrb.mxu1 %v961_v37  ;;  %v2233_v37 = vand.u32 4294901760, %v866_v27 }
  0xec   :  { %v491_v14 = vadd.f32 %v490_v13, %v454_v60  ;;  %v531_v6 = vpop.f32.mrf.mxu2  ;;  %v966_v60 = vsub.f32 %v2142_v23, %v965_v38  ;;  %v971_v13 = vand.u32 4294901760, %v2154_v54  ;;  %905 = vmatpush.msrb.mxu0 %v2165_v36  ;;  %1101 = vmatpush.msrb.mxu3 %v2165_v36  ;;  %v978_v61 = vsub.f32 %v2169_v45, %v977_v19 }
  0xee   :  { %v532_v62 = vadd.f32 %v531_v6, %v491_v14  ;;  %v967_v48 = vand.u32 4294901760, %v966_v60  ;;  %v972_v14 = vsub.f32 %v2154_v54, %v971_v13  ;;  %v2177_v6 = vsub.f32 %v872_v12, %v2165_v36 }
  0xef   :  { %v632_v20 = vpop.f32.mrf.mxu3 }
  0xf0   :  { %v633_v1 = vadd.f32 %v632_v20, %v532_v62  ;;  %v2179_v62 = vand.u32 4294901760, %v871_v44  ;;  %968 = vmatpush.msrb.mxu1 %v967_v48  ;;  %v973_v17 = vand.u32 4294901760, %v972_v14  ;;  %v983_v20 = vand.u32 4294901760, %v2177_v6  ;;  %1057 = vmatpush.msrb.mxu2 %v2177_v6 }
  0xf1   :  { %v1018_v14 = vsub.f32 %v866_v27, %v2233_v37 }
  0xf2   :  { %v2186_v9 = vsub.f32 %v871_v44, %v2179_v62  ;;  %907 = vmatpush.msrb.mxu0 %v2179_v62  ;;  %974 = vmatpush.msrb.mxu1 %v973_v17 }
  0xf3   :  { %1103 = vmatpush.msrb.mxu3 %v2179_v62 }
  0xf4   :  { %v989_v3 = vand.u32 4294901760, %v2186_v9  ;;  %909 = vmatpush.msrb.mxu0 %v2188_v34  ;;  %1060 = vmatpush.msrb.mxu2 %v2186_v9 }
  0xf5   :  { %1105 = vmatpush.msrb.mxu3 %v2188_v34 }
  0xfe   :  { %v686_v25 = vpop.f32.mrf.mxu0 }
  0xff   :  { %v687_v10 = vadd.f32 %v686_v25, %v633_v1  ;;  %v869_v25 = vld [vmem:[#allocation11 + $0x18] sm:$0xff]  ;;  %v984_v1 = vsub.f32 %v2177_v6, %v983_v20 }
 0x100   :  { %v2203_v26 = vand.u32 4294901760, %v869_v25 }
 0x102   :  { %911 = vmatpush.msrb.mxu0 %v2203_v26  ;;  %1107 = vmatpush.msrb.mxu3 %v2203_v26 }
 0x105   :  { %v725_v28 = vpop.f32.mrf.mxu1 }
 0x106   :  { %v726_v4 = vadd.f32 %v725_v28, %v687_v10  ;;  %v2201_v10 = vsub.f32 %v870_v53, %v2188_v34  ;;  %v979_v28 = vand.u32 4294901760, %v978_v61  ;;  %v1019_v61 = vand.u32 4294901760, %v1018_v14 }
 0x108   :  { %v794_v52 = vpop.f32.mrf.mxu2  ;;  %980 = vmatpush.msrb.mxu1 %v979_v28  ;;  %1063 = vmatpush.msrb.mxu2 %v2201_v10  ;;  %v1020_v28 = vsub.f32 %v1018_v14, %v1019_v61 }
 0x109   :  { %v795_v35 = vadd.f32 %v794_v52, %v726_v4  ;;  %v868_v4 = vld [vmem:[#allocation11 + $0x10] sm:$0xff]  ;;  %v985_v52 = vand.u32 4294901760, %v984_v1 }
 0x10a   :  { %v831_v5 = vpop.f32.mrf.mxu3 }
 0x10b   :  { %v832_v49 = vadd.f32 %v831_v5, %v795_v35  ;;  %v990_v35 = vsub.f32 %v2186_v9, %v989_v3  ;;  %v2213_v5 = vsub.f32 %v869_v25, %v2203_v26  ;;  %986 = vmatpush.msrb.mxu1 %v985_v52 }
 0x10d   :  { %v2114_v11 = vadd.f32 %v1275_v39, %v832_v49  ;;  %v995_v39 = vand.u32 4294901760, %v2201_v10  ;;  %v2216_v49 = vand.u32 4294901760, %v868_v4  ;;  %v991_v50 = vand.u32 4294901760, %v990_v35  ;;  %1066 = vmatpush.msrb.mxu2 %v2213_v5 }
 0x10e   :  { %v1001_v43 = vand.u32 4294901760, %v2213_v5 }
 0x10f   :  { %837 = vadd.xlane.f32.xlu0 %v2114_v11  ;;  %v839_v41 = vmul.f32 %v2114_v11, %v2114_v11  ;;  %v996_v63 = vsub.f32 %v2201_v10, %v995_v39  ;;  %v1006_v31 = vsub.f32 %v868_v4, %v2216_v49  ;;  %913 = vmatpush.msrb.mxu0 %v2216_v49  ;;  %v1021_v4 = vand.u32 4294901760, %v1020_v28 }
 0x110   :  { %v1002_v30 = vsub.f32 %v2213_v5, %v1001_v43  ;;  %1109 = vmatpush.msrb.mxu3 %v2216_v49  ;;  %992 = vmatpush.msrb.mxu1 %v991_v50 }
 0x111   :  { %v997_v7 = vand.u32 4294901760, %v996_v63  ;;  %v1007_v60 = vand.u32 4294901760, %v1006_v31  ;;  %1069 = vmatpush.msrb.mxu2 %v1006_v31 }
 0x112   :  { %v1003_v44 = vand.u32 4294901760, %v1002_v30 }
 0x113   :  { %998 = vmatpush.msrb.mxu1 %v997_v7  ;;  %v1008_v53 = vsub.f32 %v1006_v31, %v1007_v60 }
 0x115   :  { %1004 = vmatpush.msrb.mxu1 %v1003_v44  ;;  %v1009_v25 = vand.u32 4294901760, %v1008_v53 }
 0x117   :  { %840 = vadd.xlane.f32.xlu0 %v839_v41  ;;  %v867_v41 = vld [vmem:[#allocation11 + $0x8] sm:$0xff]  ;;  %1010 = vmatpush.msrb.mxu1 %v1009_v25 }
 0x118   :  { %v2223_v33 = vand.u32 4294901760, %v867_v41 }
 0x11a   :  { %v1012_v12 = vsub.f32 %v867_v41, %v2223_v33  ;;  %915 = vmatpush.msrb.mxu0 %v2223_v33  ;;  %1111 = vmatpush.msrb.mxu3 %v2223_v33 }
 0x11c   :  { %v1013_v48 = vand.u32 4294901760, %v1012_v12  ;;  %917 = vmatpush.msrb.mxu0 %v2233_v37  ;;  %1072 = vmatpush.msrb.mxu2 %v1012_v12 }
 0x11d   :  { %1113 = vmatpush.msrb.mxu3 %v2233_v37 }
 0x11e   :  { %v1014_v17 = vsub.f32 %v1012_v12, %v1013_v48  ;;  %1124 = vmatpush.msra.mxu0 %v929_v46  ;;  %1075 = vmatpush.msrb.mxu2 %v1018_v14 }
 0x120   :  { %v1015_v1 = vand.u32 4294901760, %v1014_v17  ;;  %1128 = vmatpush.msra.mxu0 %v935_v59 }
 0x122   :  { %1132 = vmatpush.msra.mxu0 %v941_v22  ;;  %1016 = vmatpush.msrb.mxu1 %v1015_v1 }
 0x124   :  { %1136 = vmatpush.msra.mxu0 %v947_v40  ;;  %1022 = vmatpush.msrb.mxu1 %v1021_v4 }
 0x126   :  { %1191 = vmatpush.msra.mxu1 %v2066_v47  ;;  %1140 = vmatpush.msra.mxu0 %v953_v18 }
 0x128   :  { %1193 = vmatpush.msra.mxu1 %v2068_v2  ;;  %1144 = vmatpush.msra.mxu0 %v959_v24 }
 0x12a   :  { %1195 = vmatpush.msra.mxu1 %v2070_v32  ;;  %1148 = vmatpush.msra.mxu0 %v965_v38 }
 0x12c   :  { %1197 = vmatpush.msra.mxu1 %v2072_v42  ;;  %1152 = vmatpush.msra.mxu0 %v971_v13 }
 0x12e   :  { %1199 = vmatpush.msra.mxu1 %v2119_v57  ;;  %1156 = vmatpush.msra.mxu0 %v977_v19 }
 0x130   :  { %1201 = vmatpush.msra.mxu1 %v2124_v0  ;;  %1160 = vmatpush.msra.mxu0 %v983_v20  ;;  %v1276_v0 = vld [vmem:[#allocation10 + $0x1] ss:$0 sm:$0xff] }
 0x132   :  { %1203 = vmatpush.msra.mxu1 %v2132_v58  ;;  %1164 = vmatpush.msra.mxu0 %v989_v3 }
 0x134   :  { %1205 = vmatpush.msra.mxu1 %v2144_v51  ;;  %1168 = vmatpush.msra.mxu0 %v995_v39 }
 0x136   :  { %1207 = vmatpush.msra.mxu1 %v2158_v56  ;;  %1172 = vmatpush.msra.mxu0 %v1001_v43 }
 0x138   :  { %1209 = vmatpush.msra.mxu1 %v2165_v36  ;;  %1176 = vmatpush.msra.mxu0 %v1007_v60 }
 0x13a   :  { %1211 = vmatpush.msra.mxu1 %v2179_v62  ;;  %1180 = vmatpush.msra.mxu0 %v1013_v48 }
 0x13c   :  { %1213 = vmatpush.msra.mxu1 %v2188_v34  ;;  %1184 = vmatpush.msra.mxu0 %v1019_v61 }
 0x13e   :  { %1215 = vmatpush.msra.mxu1 %v2203_v26 }
 0x140   :  { %1217 = vmatpush.msra.mxu1 %v2216_v49 }
 0x142   :  { %1219 = vmatpush.msra.mxu1 %v2223_v33 }
 0x144   :  { %1221 = vmatpush.msra.mxu1 %v2233_v37 }
 0x182   :  { %v838_v21 = vpop.xlane.xlu0 %837 }
 0x183   :  { %v842_v47 = vmul.f32 0.03125, %v838_v21 }
 0x185   :  { %v844_v32 = vmul.f32 %v842_v47, %v842_v47  ;;  %v846_v55 = vsub.f32 %v2114_v11, %v842_v47  ;;  %v1278_v11 = vld [vmem:[%s2300_s6] ss:$0 sm:$0xff] }
 0x18a   :  { %v841_v2 = vpop.xlane.xlu0 %840 }
 0x18b   :  { %v843_v42 = vmul.f32 0.03125, %v841_v2 }
 0x18d   :  { %v845_v15 = vsub.f32 %v843_v42, %v844_v32 }
 0x18f   :  { %v847_v29 = vadd.f32 1e-05, %v845_v15 }
 0x191   :  { %1279 = vrsqrt.f32 %v847_v29  ;;  %vm854_vm1 = vweird.f32 %v847_v29 }
 0x197   :  { %v1280_v16 = vpop.eup %1279 }
 0x198   :  { %v849_v46 = vmul.f32 %v1280_v16, %v847_v29  ;;  %vm855_vm0 = vweird.f32 %v1280_v16 }
 0x199   :  { %vm856_vm2 = vmor %vm854_vm1, %vm855_vm0 }
 0x19a   :  { %v850_v59 = vmul.f32 %v1280_v16, %v849_v46 }
 0x19c   :  { %v851_v22 = vmul.f32 0.5, %v850_v59 }
 0x19e   :  { %v852_v40 = vsub.f32 1.5, %v851_v22 }
 0x1a0   :  { %v853_v57 = vmul.f32 %v1280_v16, %v852_v40 }
 0x1a2   :  { %v857_v18 = vsel %vm856_vm2, %v1280_v16, %v853_v57 }
 0x1a3   :  { %v858_v58 = vmul.f32 %v857_v18, %v846_v55 }
 0x1a5   :  { %v861_v24 = vmul.f32 %v1276_v0, %v858_v58 }
 0x1a7   :  { %v864_v23 = vadd.f32 %v1277_v8, %v861_v24 }
 0x1a9   :  { %1281 = vtanh.f32 %v864_v23 }
 0x1af   :  { %v1282_v51 = vpop.eup %1281 }
 0x1b0   :  { %1228 = vst [vmem:[#allocation14] sm:$0xff] %v1282_v51  ;;  %v918_v38 = vand.u32 4294901760, %v1282_v51 }
 0x1b1   :  { %1250 = dma.vmem_to_hbm [thread:$0]  %s1246_s5, 128, %s1248_s13, [#allocation15]  }
 0x1b2   :  { %1024 = vmatmul.f32.vlgmr.msrb.gmra.mxu1 %v918_v38  ;;  %v919_v54 = vsub.f32 %v1282_v51, %v918_v38 }
 0x1b4   :  { %1078 = vmatmul.f32.vlgmr.msrb.gmra.mxu2 %v919_v54  ;;  %v920_v56 = vand.u32 4294901760, %v919_v54 }
 0x1b6   :  { %1117 = vmatmul.f32.vlgmr.msrb.gmra.mxu3 %v920_v56  ;;  %v921_v13 = vsub.f32 %v919_v54, %v920_v56 }
 0x1b8   :  { %v922_v36 = vand.u32 4294901760, %v921_v13 }
 0x1ba   :  { %923 = vmatmul.f32.vlgmr.msrb.gmra.mxu0 %v922_v36  ;;  %1223 = vmatmul.f32.vlgmr.msra.gmra.mxu1 %v918_v38 }
 0x1c2   :  { %1186 = vmatmul.f32.vlgmr.msra.gmra.mxu0 %v918_v38 }
 0x22f   :  { %v1025_v45 = vpop.f32.mrf.mxu1 }
 0x237   :  { %v924_v6 = vpop.f32.mrf.mxu0  ;;  %v1079_v20 = vpop.f32.mrf.mxu2 }
 0x238   :  { %v925_v62 = vadd.f32 %v1278_v11, %v924_v6  ;;  %v1224_v52 = vpop.f32.mrf.mxu1 }
 0x239   :  { %v1118_v34 = vpop.f32.mrf.mxu3 }
 0x23a   :  { %v1026_v19 = vadd.f32 %v1025_v45, %v925_v62 }
 0x23c   :  { %v1080_v9 = vadd.f32 %v1079_v20, %v1026_v19 }
 0x23e   :  { %v1119_v3 = vadd.f32 %v1118_v34, %v1080_v9 }
 0x23f   :  { %v1187_v10 = vpop.f32.mrf.mxu0 }
 0x240   :  { %v1188_v26 = vadd.f32 %v1187_v10, %v1119_v3 }
 0x242   :  { %v1225_v35 = vadd.f32 %v1224_v52, %v1188_v26 }
 0x244   :  { %1227 = vst [vmem:[#allocation13] sm:$0xff] %v1225_v35 }
 0x245   :  { %1239 = dma.vmem_to_hbm [thread:$0]  %s1235_s17, 128, %s1237_s18, [#allocation4]  }
 0x246   :  { %1483 = dma.done.wait [#allocation4], 128  }
 0x247   :  { %1484 = vsyncadd [#allocation4], 4294967168 }
 0x248   :  { %1485 = dma.done.wait [#allocation15], 128  }
 0x249   :  { %1486 = vsyncadd [#allocation15], 4294967168 }
 0x24a   :  { %1259 = vsyncpa [#allocation3], 1 }
 0x24b   :  { %1260 = vsyncpa [#allocation6], 1 }
 0x24c   :  { %1261 = vsyncpa [#allocation9], 1 }
 0x24d   :  { %1262 = vsyncpa [#allocation12], 1 }
 0x24e   :  { %1263 = vsyncpa [#allocation4], 1 }
 0x24f   :  { %1264 = vsyncpa [#allocation15], 1 }

// kernel: tpu_custom_call.1
= control target key start
LH: loop header
LB: loop body
LE: loop exit
PB: predicated region body
PF: predicated region fallthrough
CT: control target
= control target key end

     0   :  { %14 = vsyncpa [#allocation3], 0  ;;  %s2294_s0 = inlined_call_operand.hbm [shape: f32[8,128], index: 0, kind: input, shape index: {}]   ;;  %s2295_s1 = inlined_call_operand.hbm [shape: f32[8,128], index: 1, kind: input, shape index: {}]   ;;  %s2296_s2 = inlined_call_operand.hbm [shape: f32[128,128], index: 2, kind: input, shape index: {}]   ;;  %s2297_s3 = inlined_call_operand.hbm [shape: f32[128,128], index: 3, kind: input, shape index: {}]   ;;  %s2298_s4 = inlined_call_operand.hbm [shape: f32[8,128], index: 4, kind: input, shape index: {}]   ;;  %s2299_s5 = inlined_call_operand.hbm [shape: f32[128,128], index: 5, kind: input, shape index: {}]   ;;  %s2300_s6 = inlined_call_operand.vmem [shape: f32[1,128], index: 6, kind: input, shape index: {}]   ;;  %s2301_s7 = inlined_call_operand.hbm [shape: f32[8,128], index: 7, kind: output, shape index: {0}]   ;;  %s2302_s8 = inlined_call_operand.hbm [shape: f32[8,128], index: 8, kind: output, shape index: {1}]  }
   0x1   :  { %15 = vsyncpa [#allocation6], 0 }
   0x2   :  { %16 = vsyncpa [#allocation9], 0 }
   0x3   :  { %17 = vsyncpa [#allocation12], 0 }
   0x4   :  { %18 = vsyncpa [#allocation4], 0  ;;  %s36_s29 = sshll.u32 %s2295_s1, 4  ;;  %s37_s29 = int_to_ptr.hbm [resolvable:$true] %s36_s29 }
   0x5   :  { %19 = vsyncpa [#allocation15], 0  ;;  %s1487_s30 = smov [#allocation5]   ;;  %s59_s12 = sshll.u32 %s2297_s3, 4  ;;  %s60_s12 = int_to_ptr.hbm [resolvable:$true] %s59_s12 }
   0x6   :  { %s38_s9 = sshll.u32 %s1487_s30, 4  ;;  %s1488_s13 = smov [#allocation8]   ;;  %s39_s9 = int_to_ptr.vmem [resolvable:$true] %s38_s9 }
   0x7   :  { %41 = dma.hbm_to_vmem [thread:$0]  %s37_s29, 128, %s39_s9, [#allocation6]  }
   0x8   :  { %s61_s14 = sshll.u32 %s1488_s13, 4  ;;  %s25_s17 = sshll.u32 %s2294_s0, 4  ;;  %s62_s14 = int_to_ptr.vmem [resolvable:$true] %s61_s14  ;;  %s26_s17 = int_to_ptr.hbm [resolvable:$true] %s25_s17 }
   0x9   :  { %s1489_s1 = smov 128   ;;  %s1490_s18 = smov 8  }
   0xa   :  { %67 = dma.hbm_to_vmem [thread:$0]  %s60_s12, 2048, %s62_s14, [#allocation9], %s1489_s1, %s1489_s1, %s1490_s18  }
   0xb   :  { %s46_s21 = sshll.u32 %s2296_s2, 4  ;;  %s1491_s22 = smov [#allocation2]   ;;  %s47_s21 = int_to_ptr.hbm [resolvable:$true] %s46_s21 }
   0xc   :  { %s27_s23 = sshll.u32 %s1491_s22, 4  ;;  %s1492_s3 = smov [#allocation7]   ;;  %s28_s23 = int_to_ptr.vmem [resolvable:$true] %s27_s23 }
   0xd   :  { %30 = dma.hbm_to_vmem [thread:$0]  %s26_s17, 128, %s28_s23, [#allocation3]  }
   0xe   :  { %s48_s24 = sshll.u32 %s1492_s3, 4  ;;  %s73_s0 = sshll.u32 %s2298_s4, 4  ;;  %s49_s24 = int_to_ptr.vmem [resolvable:$true] %s48_s24  ;;  %s74_s0 = int_to_ptr.hbm [resolvable:$true] %s73_s0 }
   0xf   :  { %54 = dma.hbm_to_vmem [thread:$0]  %s47_s21, 2048, %s49_s24, [#allocation6], %s1489_s1, %s1489_s1, %s1490_s18  }
  0x10   :  { %s83_s29 = sshll.u32 %s2299_s5, 4  ;;  %s1493_s30 = smov [#allocation10]   ;;  %s84_s29 = int_to_ptr.hbm [resolvable:$true] %s83_s29 }
  0x11   :  { %s75_s2 = sshll.u32 %s1493_s30, 4  ;;  %s1494_s9 = smov [#allocation11]   ;;  %s76_s2 = int_to_ptr.vmem [resolvable:$true] %s75_s2 }
  0x12   :  { %78 = dma.hbm_to_vmem [thread:$0]  %s74_s0, 128, %s76_s2, [#allocation9]  }
  0x13   :  { %s85_s10 = sshll.u32 %s1494_s9, 4  ;;  %s86_s10 = int_to_ptr.vmem [resolvable:$true] %s85_s10 }
  0x14   :  { %91 = dma.hbm_to_vmem [thread:$0]  %s84_s29, 2048, %s86_s10, [#allocation12], %s1489_s1, %s1489_s1, %s1490_s18  }
  0x15   :  { %1475 = dma.done.wait [#allocation3], 128  }
  0x16   :  { %1476 = vsyncadd [#allocation3], 4294967168 }
  0x17   :  { %1477 = dma.done.wait [#allocation6], 2176  }
  0x18   :  { %1478 = vsyncadd [#allocation6], 4294965120 }
  0x19   :  { %1479 = dma.done.wait [#allocation9], 2176  }
  0x1a   :  { %1480 = vsyncadd [#allocation9], 4294965120 }
  0x1b   :  { %1481 = dma.done.wait [#allocation12], 2048  }
  0x1c   :  { %1482 = vsyncadd [#allocation12], 4294965248  ;;  %v151_v0 = vld [vmem:[#allocation8 + $0x78] sm:$0xff]  ;;  %v150_v1 = vld [vmem:[#allocation8 + $0x70] sm:$0xff]  ;;  %s1495_s4 = smov [#allocation14]   ;;  %s1247_s13 = sshll.u32 %s2302_s8, 4  ;;  %s1248_s13 = int_to_ptr.hbm [resolvable:$true] %s1247_s13 }
  0x1d   :  { %v149_v2 = vld [vmem:[#allocation8 + $0x68] sm:$0xff]  ;;  %v1560_v3 = vand.u32 4294901760, %v151_v0  ;;  %v1562_v4 = vand.u32 4294901760, %v150_v1  ;;  %v148_v6 = vld [vmem:[#allocation8 + $0x60] sm:$0xff]  ;;  %v147_v7 = vld [vmem:[#allocation8 + $0x58] sm:$0xff]  ;;  %s1245_s5 = sshll.u32 %s1495_s4, 4  ;;  %s1246_s5 = int_to_ptr.vmem [resolvable:$true] %s1245_s5 }
  0x1e   :  { %v1564_v5 = vand.u32 4294901760, %v149_v2  ;;  %v146_v8 = vld [vmem:[#allocation8 + $0x50] sm:$0xff]  ;;  %v1566_v9 = vand.u32 4294901760, %v148_v6  ;;  %v1568_v10 = vand.u32 4294901760, %v147_v7  ;;  %v145_v12 = vld [vmem:[#allocation8 + $0x48] sm:$0xff]  ;;  %v144_v13 = vld [vmem:[#allocation8 + $0x40] sm:$0xff] }
  0x1f   :  { %v1570_v11 = vand.u32 4294901760, %v146_v8  ;;  %153 = vmatpush.msra.mxu0 %v1560_v3  ;;  %v1574_v14 = vsub.f32 %v151_v0, %v1560_v3  ;;  %v1577_v15 = vsub.f32 %v150_v1, %v1562_v4  ;;  %349 = vmatpush.msra.mxu3 %v1560_v3  ;;  %v1583_v17 = vand.u32 4294901760, %v145_v12  ;;  %v143_v18 = vld [vmem:[#allocation8 + $0x38] sm:$0xff]  ;;  %v142_v26 = vld [vmem:[#allocation8 + $0x30] sm:$0xff]  ;;  %v141_v34 = vld [vmem:[#allocation8 + $0x28] sm:$0xff]  ;;  %s1496_s16 = smov [#allocation13]  }
  0x20   :  { %v1581_v16 = vsub.f32 %v149_v2, %v1564_v5  ;;  %v1586_v19 = vsub.f32 %v148_v6, %v1566_v9  ;;  %v1589_v20 = vsub.f32 %v147_v7, %v1568_v10  ;;  %v1599_v25 = vand.u32 4294901760, %v144_v13  ;;  %v140_v42 = vld [vmem:[#allocation8 + $0x20] sm:$0xff]  ;;  %v139_v48 = vld [vmem:[#allocation8 + $0x18] sm:$0xff]  ;;  %v138_v54 = vld [vmem:[#allocation8 + $0x10] sm:$0xff]  ;;  %s1234_s17 = sshll.u32 %s1496_s16, 4  ;;  %s1236_s18 = sshll.u32 %s2301_s7, 4  ;;  %s1235_s17 = int_to_ptr.vmem [resolvable:$true] %s1234_s17  ;;  %s1237_s18 = int_to_ptr.hbm [resolvable:$true] %s1236_s18 }
  0x21   :  { %v1592_v21 = vsub.f32 %v146_v8, %v1570_v11  ;;  %155 = vmatpush.msra.mxu0 %v1562_v4  ;;  %296 = vmatpush.msra.mxu2 %v1574_v14  ;;  %v195_v22 = vand.u32 4294901760, %v1574_v14  ;;  %v2318_v23 = vand.u32 4294901760, %v1577_v15  ;;  %v1603_v28 = vand.u32 4294901760, %v143_v18  ;;  %v134_v59 = vld [vmem:[#allocation7 + $0x78] sm:$0xff]  ;;  %v137_v61 = vld [vmem:[#allocation8 + $0x8] sm:$0xff]  ;;  %v136_v2 = vld [vmem:[#allocation8] sm:$0xff] }
  0x22   :  { %v2316_v24 = vand.u32 4294901760, %v1581_v16  ;;  %351 = vmatpush.msra.mxu3 %v1562_v4  ;;  %v2314_v27 = vand.u32 4294901760, %v1586_v19  ;;  %v1606_v29 = vsub.f32 %v145_v12, %v1583_v17  ;;  %v2312_v33 = vand.u32 4294901760, %v1589_v20  ;;  %v133_v6 = vld [vmem:[#allocation7 + $0x70] sm:$0xff] }
  0x23   :  { %157 = vmatpush.msra.mxu0 %v1564_v5  ;;  %299 = vmatpush.msra.mxu2 %v1577_v15  ;;  %v196_v30 = vsub.f32 %v1574_v14, %v195_v22  ;;  %v202_v31 = vsub.f32 %v1577_v15, %v2318_v23  ;;  %v1621_v35 = vand.u32 4294901760, %v142_v26  ;;  %v2310_v36 = vand.u32 4294901760, %v1592_v21 }
  0x24   :  { %v208_v32 = vsub.f32 %v1581_v16, %v2316_v24  ;;  %353 = vmatpush.msra.mxu3 %v1564_v5  ;;  %v214_v39 = vsub.f32 %v1586_v19, %v2314_v27  ;;  %v1630_v40 = vsub.f32 %v144_v13, %v1599_v25  ;;  %v1633_v41 = vand.u32 4294901760, %v141_v34 }
  0x25   :  { %159 = vmatpush.msra.mxu0 %v1566_v9  ;;  %v197_v37 = vand.u32 4294901760, %v196_v30  ;;  %302 = vmatpush.msra.mxu2 %v1581_v16  ;;  %v203_v38 = vand.u32 4294901760, %v202_v31  ;;  %v220_v44 = vsub.f32 %v1589_v20, %v2312_v33  ;;  %v2309_v45 = vand.u32 4294901760, %v1606_v29 }
  0x26   :  { %355 = vmatpush.msra.mxu3 %v1566_v9  ;;  %v209_v43 = vand.u32 4294901760, %v208_v32  ;;  %v1641_v46 = vsub.f32 %v143_v18, %v1603_v28  ;;  %v226_v47 = vsub.f32 %v1592_v21, %v2310_v36  ;;  %v215_v49 = vand.u32 4294901760, %v214_v39  ;;  %v132_v32 = vld [vmem:[#allocation7 + $0x68] sm:$0xff] }
  0x27   :  { %161 = vmatpush.msra.mxu0 %v1568_v10  ;;  %198 = vmatpush.msra.mxu1 %v197_v37  ;;  %v1649_v50 = vand.u32 4294901760, %v140_v42  ;;  %v2308_v51 = vand.u32 4294901760, %v1630_v40  ;;  %v1653_v52 = vsub.f32 %v142_v26, %v1621_v35  ;;  %v1658_v53 = vsub.f32 %v141_v34, %v1633_v41 }
  0x28   :  { %305 = vmatpush.msra.mxu2 %v1586_v19  ;;  %357 = vmatpush.msra.mxu3 %v1568_v10  ;;  %v221_v55 = vand.u32 4294901760, %v220_v44  ;;  %v232_v56 = vsub.f32 %v1606_v29, %v2309_v45  ;;  %v1664_v57 = vand.u32 4294901760, %v139_v48  ;;  %v2307_v58 = vand.u32 4294901760, %v1641_v46  ;;  %v131_v44 = vld [vmem:[#allocation7 + $0x60] sm:$0xff] }
  0x29   :  { %163 = vmatpush.msra.mxu0 %v1570_v11  ;;  %204 = vmatpush.msra.mxu1 %v203_v38  ;;  %v227_v60 = vand.u32 4294901760, %v226_v47  ;;  %v238_v62 = vsub.f32 %v1630_v40, %v2308_v51  ;;  %v1673_v63 = vand.u32 4294901760, %v138_v54  ;;  %v2305_v0 = vand.u32 4294901760, %v1653_v52  ;;  %v127_v45 = vld [vmem:[#allocation7 + $0x40] sm:$0xff] }
  0x2a   :  { %308 = vmatpush.msra.mxu2 %v1589_v20  ;;  %359 = vmatpush.msra.mxu3 %v1570_v11  ;;  %v1677_v1 = vsub.f32 %v140_v42, %v1649_v50  ;;  %v2304_v7 = vand.u32 4294901760, %v1658_v53  ;;  %v1682_v8 = vand.u32 4294901760, %v134_v59  ;;  %v233_v12 = vand.u32 4294901760, %v232_v56 }
  0x2b   :  { %165 = vmatpush.msra.mxu0 %v1583_v17  ;;  %210 = vmatpush.msra.mxu1 %v209_v43  ;;  %v244_v13 = vsub.f32 %v1641_v46, %v2307_v58  ;;  %v1688_v18 = vand.u32 4294901760, %v137_v61  ;;  %v1691_v26 = vsub.f32 %v139_v48, %v1664_v57  ;;  %v1695_v30 = vand.u32 4294901760, %v136_v2 }
  0x2c   :  { %311 = vmatpush.msra.mxu2 %v1592_v21  ;;  %361 = vmatpush.msra.mxu3 %v1583_v17  ;;  %v1697_v31 = vand.u32 4294901760, %v133_v6  ;;  %v239_v34 = vand.u32 4294901760, %v238_v62  ;;  %v250_v37 = vsub.f32 %v1653_v52, %v2305_v0  ;;  %v2303_v38 = vand.u32 4294901760, %v1677_v1 }
  0x2d   :  { %167 = vmatpush.msra.mxu0 %v1599_v25  ;;  %216 = vmatpush.msra.mxu1 %v215_v49  ;;  %2322 = vst [vmem:[#allocation22_spill] sm:$0xff] %v1695_v30  ;;  %v1705_v39 = vsub.f32 %v138_v54, %v1673_v63  ;;  %v256_v42 = vsub.f32 %v1658_v53, %v2304_v7  ;;  %v245_v47 = vand.u32 4294901760, %v244_v13  ;;  %v2306_v48 = vand.u32 4294901760, %v1691_v26  ;;  %v129_v13 = vld [vmem:[#allocation7 + $0x50] sm:$0xff] }
  0x2e   :  { %314 = vmatpush.msra.mxu2 %v1606_v29  ;;  %363 = vmatpush.msra.mxu3 %v1599_v25  ;;  %v1713_v43 = vsub.f32 %v134_v59, %v1682_v8  ;;  %v1718_v49 = vsub.f32 %v137_v61, %v1688_v18  ;;  %v1720_v54 = vand.u32 4294901760, %v132_v32  ;;  %v1728_v56 = vsub.f32 %v133_v6, %v1697_v31  ;;  %v130_v59 = vld [vmem:[#allocation7 + $0x58] sm:$0xff] }
  0x2f   :  { %169 = vmatpush.msra.mxu0 %v1603_v28  ;;  %222 = vmatpush.msra.mxu1 %v221_v55  ;;  %v1725_v55 = vsub.f32 %v136_v2, %v1695_v30  ;;  %v262_v61 = vsub.f32 %v1677_v1, %v2303_v38  ;;  %v2311_v62 = vand.u32 4294901760, %v1705_v39  ;;  %v257_v2 = vand.u32 4294901760, %v256_v42  ;;  %v128_v42 = vld [vmem:[#allocation7 + $0x48] sm:$0xff] }
  0x30   :  { %317 = vmatpush.msra.mxu2 %v1630_v40  ;;  %365 = vmatpush.msra.mxu3 %v1603_v28  ;;  %v2313_v6 = vand.u32 4294901760, %v1713_v43  ;;  %v1746_v38 = vsub.f32 %v132_v32, %v1720_v54  ;;  %v1748_v7 = vand.u32 4294901760, %v130_v59  ;;  %v1761_v51 = vand.u32 4294901760, %v129_v13 }
  0x31   :  { %171 = vmatpush.msra.mxu0 %v1621_v35  ;;  %228 = vmatpush.msra.mxu1 %v227_v60  ;;  %v251_v60 = vand.u32 4294901760, %v250_v37  ;;  %v2315_v37 = vand.u32 4294901760, %v1718_v49  ;;  %v2319_v0 = vand.u32 4294901760, %v1725_v55  ;;  %v274_v32 = vsub.f32 %v1705_v39, %v2311_v62 }
  0x32   :  { %320 = vmatpush.msra.mxu2 %v1641_v46  ;;  %367 = vmatpush.msra.mxu3 %v1621_v35  ;;  %v537_v36 = vsub.f32 %v1713_v43, %v2313_v6  ;;  %v2320_v62 = vand.u32 4294901760, %v1746_v38  ;;  %v1776_v33 = vsub.f32 %v130_v59, %v1748_v7  ;;  %v1783_v27 = vand.u32 4294901760, %v127_v45 }
  0x33   :  { %173 = vmatpush.msra.mxu0 %v1633_v41  ;;  %234 = vmatpush.msra.mxu1 %v233_v12  ;;  %v1735_v12 = vand.u32 4294901760, %v131_v44  ;;  %v286_v59 = vsub.f32 %v1725_v55, %v2319_v0  ;;  %v1791_v24 = vsub.f32 %v129_v13, %v1761_v51  ;;  %v2323_v14 = vand.u32 4294901760, %v1577_v15 }
  0x34   :  { %323 = vmatpush.msra.mxu2 %v1653_v52  ;;  %369 = vmatpush.msra.mxu3 %v1633_v41  ;;  %v549_v0 = vsub.f32 %v1746_v38, %v2320_v62  ;;  %v2325_v15 = vand.u32 4294901760, %v1581_v16  ;;  %v2327_v16 = vand.u32 4294901760, %v1586_v19  ;;  %v2329_v19 = vand.u32 4294901760, %v1589_v20 }
  0x35   :  { %175 = vmatpush.msra.mxu0 %v1649_v50  ;;  %240 = vmatpush.msra.mxu1 %v239_v34  ;;  %v268_v34 = vsub.f32 %v1691_v26, %v2306_v48  ;;  %v263_v48 = vand.u32 4294901760, %v262_v61  ;;  %v1759_v58 = vsub.f32 %v131_v44, %v1735_v12  ;;  %v280_v44 = vsub.f32 %v1718_v49, %v2315_v37 }
  0x36   :  { %326 = vmatpush.msra.mxu2 %v1658_v53  ;;  %371 = vmatpush.msra.mxu3 %v1649_v50  ;;  %v2331_v20 = vand.u32 4294901760, %v1592_v21  ;;  %v2333_v21 = vand.u32 4294901760, %v1606_v29  ;;  %v2335_v29 = vand.u32 4294901760, %v1630_v40  ;;  %v2337_v40 = vand.u32 4294901760, %v1641_v46 }
  0x37   :  { %177 = vmatpush.msra.mxu0 %v1664_v57  ;;  %246 = vmatpush.msra.mxu1 %v245_v47  ;;  %v2317_v47 = vand.u32 4294901760, %v1728_v56  ;;  %v269_v61 = vand.u32 4294901760, %v268_v34  ;;  %v275_v34 = vand.u32 4294901760, %v274_v32  ;;  %v281_v32 = vand.u32 4294901760, %v280_v44 }
  0x38   :  { %329 = vmatpush.msra.mxu2 %v1677_v1  ;;  %373 = vmatpush.msra.mxu3 %v1664_v57  ;;  %v2324_v44 = vand.u32 4294901760, %v1759_v58 }
  0x39   :  { %179 = vmatpush.msra.mxu0 %v1673_v63  ;;  %252 = vmatpush.msra.mxu1 %v251_v60  ;;  %v1768_v60 = vand.u32 4294901760, %v128_v42  ;;  %v543_v6 = vsub.f32 %v1728_v56, %v2317_v47  ;;  %v538_v47 = vand.u32 4294901760, %v537_v36  ;;  %v1810_v36 = vsub.f32 %v127_v45, %v1783_v27 }
  0x3a   :  { %332 = vmatpush.msra.mxu2 %v1691_v26  ;;  %375 = vmatpush.msra.mxu3 %v1673_v63  ;;  %v555_v62 = vsub.f32 %v1759_v58, %v2324_v44 }
  0x3b   :  { %181 = vmatpush.msra.mxu0 %v1688_v18  ;;  %258 = vmatpush.msra.mxu1 %v257_v2  ;;  %v126_v2 = vld [vmem:[#allocation7 + $0x38] sm:$0xff]  ;;  %v1797_v23 = vsub.f32 %v128_v42, %v1768_v60  ;;  %v124_v42 = vld [vmem:[#allocation7 + $0x28] sm:$0xff] }
  0x3c   :  { %335 = vmatpush.msra.mxu2 %v1705_v39  ;;  %377 = vmatpush.msra.mxu3 %v1688_v18  ;;  %v1804_v37 = vand.u32 4294901760, %v126_v2  ;;  %v1829_v13 = vand.u32 4294901760, %v124_v42 }
  0x3d   :  { %183 = vmatpush.msra.mxu0 %v1695_v30  ;;  %264 = vmatpush.msra.mxu1 %v263_v48  ;;  %v125_v48 = vld [vmem:[#allocation7 + $0x30] sm:$0xff] }
  0x3e   :  { %338 = vmatpush.msra.mxu2 %v1718_v49  ;;  %379 = vmatpush.msra.mxu3 %v1695_v30  ;;  %v1817_v30 = vand.u32 4294901760, %v125_v48  ;;  %v1827_v44 = vsub.f32 %v126_v2, %v1804_v37 }
  0x3f   :  { %390 = vmatpush.msrb.mxu0 %v195_v22  ;;  %270 = vmatpush.msra.mxu1 %v269_v61  ;;  %v544_v22 = vand.u32 4294901760, %v543_v6  ;;  %v287_v61 = vand.u32 4294901760, %v286_v59  ;;  %v123_v6 = vld [vmem:[#allocation7 + $0x20] sm:$0xff]  ;;  %v2326_v59 = vand.u32 4294901760, %v1776_v33 }
  0x40   :  { %341 = vmatpush.msra.mxu2 %v1725_v55  ;;  %539 = vmatpush.msrb.mxu3 %v538_v47  ;;  %v1839_v2 = vsub.f32 %v125_v48, %v1817_v30  ;;  %v1841_v45 = vand.u32 4294901760, %v123_v6  ;;  %v1852_v48 = vsub.f32 %v124_v42, %v1829_v13 }
  0x41   :  { %394 = vmatpush.msrb.mxu0 %v2323_v14  ;;  %276 = vmatpush.msra.mxu1 %v275_v34  ;;  %v550_v34 = vand.u32 4294901760, %v549_v0  ;;  %v561_v14 = vsub.f32 %v1776_v33, %v2326_v59  ;;  %v556_v0 = vand.u32 4294901760, %v555_v62 }
  0x42   :  { %494 = vmatpush.msrb.mxu2 %v1682_v8  ;;  %545 = vmatpush.msrb.mxu3 %v544_v22  ;;  %v2330_v22 = vand.u32 4294901760, %v1797_v23  ;;  %v1865_v42 = vsub.f32 %v123_v6, %v1841_v45 }
  0x43   :  { %398 = vmatpush.msrb.mxu0 %v2325_v15  ;;  %282 = vmatpush.msra.mxu1 %v281_v32  ;;  %v122_v15 = vld [vmem:[#allocation7 + $0x18] sm:$0xff]  ;;  %v2328_v32 = vand.u32 4294901760, %v1791_v24  ;;  %v562_v62 = vand.u32 4294901760, %v561_v14 }
  0x44   :  { %496 = vmatpush.msrb.mxu2 %v1697_v31  ;;  %551 = vmatpush.msrb.mxu3 %v550_v34  ;;  %v1854_v47 = vand.u32 4294901760, %v122_v15 }
  0x45   :  { %402 = vmatpush.msrb.mxu0 %v2327_v16  ;;  %288 = vmatpush.msra.mxu1 %v287_v61  ;;  %v567_v59 = vsub.f32 %v1791_v24, %v2328_v32  ;;  %v573_v61 = vsub.f32 %v1797_v23, %v2330_v22  ;;  %v135_v16 = vld [vmem:[#allocation5] sm:$0xff]  ;;  %v121_v22 = vld [vmem:[#allocation7 + $0x10] sm:$0xff] }
  0x46   :  { %498 = vmatpush.msrb.mxu2 %v1720_v54  ;;  %557 = vmatpush.msrb.mxu3 %v556_v0  ;;  %v1867_v32 = vand.u32 4294901760, %v135_v16  ;;  %v2334_v0 = vand.u32 4294901760, %v1827_v44  ;;  %v1877_v6 = vand.u32 4294901760, %v121_v22  ;;  %v1880_v14 = vsub.f32 %v122_v15, %v1854_v47 }
  0x47   :  { %406 = vmatpush.msrb.mxu0 %v2329_v19  ;;  %457 = vmatpush.msrb.mxu1 %v1560_v3  ;;  %v2332_v3 = vand.u32 4294901760, %v1810_v36  ;;  %v568_v34 = vand.u32 4294901760, %v567_v59 }
  0x48   :  { %500 = vmatpush.msrb.mxu2 %v1735_v12  ;;  %563 = vmatpush.msrb.mxu3 %v562_v62  ;;  %v585_v59 = vsub.f32 %v1827_v44, %v2334_v0  ;;  %v1891_v0 = vsub.f32 %v135_v16, %v1867_v32  ;;  %v1904_v16 = vsub.f32 %v121_v22, %v1877_v6 }
  0x49   :  { %410 = vmatpush.msrb.mxu0 %v2331_v20  ;;  %459 = vmatpush.msrb.mxu1 %v1562_v4  ;;  %v579_v19 = vsub.f32 %v1810_v36, %v2332_v3  ;;  %v574_v4 = vand.u32 4294901760, %v573_v61  ;;  %v120_v20 = vld [vmem:[#allocation7 + $0x8] sm:$0xff]  ;;  %v2336_v61 = vand.u32 4294901760, %v1839_v2  ;;  %v119_v3 = vld [vmem:[#allocation7] sm:$0xff] }
  0x4a   :  { %502 = vmatpush.msrb.mxu2 %v1748_v7  ;;  %569 = vmatpush.msrb.mxu3 %v568_v34  ;;  %v1893_v15 = vand.u32 4294901760, %v120_v20  ;;  %v1909_v46 = vand.u32 4294901760, %v119_v3 }
  0x4b   :  { %414 = vmatpush.msrb.mxu0 %v2333_v21  ;;  %461 = vmatpush.msrb.mxu1 %v1564_v5  ;;  %v580_v5 = vand.u32 4294901760, %v579_v19  ;;  %v591_v62 = vsub.f32 %v1839_v2, %v2336_v61  ;;  %v602_v21 = vand.u32 4294901760, %v1865_v42  ;;  %v2338_v19 = vand.u32 4294901760, %v1852_v48 }
  0x4c   :  { %504 = vmatpush.msrb.mxu2 %v1761_v51  ;;  %575 = vmatpush.msrb.mxu3 %v574_v4  ;;  %v2339_v61 = vand.u32 4294901760, %v1653_v52  ;;  %v1917_v22 = vsub.f32 %v120_v20, %v1893_v15  ;;  %v2340_v52 = vand.u32 4294901760, %v1658_v53  ;;  %v1931_v53 = vsub.f32 %v119_v3, %v1909_v46 }
  0x4d   :  { %418 = vmatpush.msrb.mxu0 %v2335_v29  ;;  %463 = vmatpush.msrb.mxu1 %v1566_v9  ;;  %v586_v9 = vand.u32 4294901760, %v585_v59  ;;  %v597_v34 = vsub.f32 %v1852_v48, %v2338_v19  ;;  %v608_v29 = vand.u32 4294901760, %v1880_v14  ;;  %v603_v4 = vsub.f32 %v1865_v42, %v602_v21 }
  0x4e   :  { %506 = vmatpush.msrb.mxu2 %v1768_v60  ;;  %581 = vmatpush.msrb.mxu3 %v580_v5  ;;  %v186_v59 = vand.u32 4294901760, %v1891_v0  ;;  %v2341_v19 = vand.u32 4294901760, %v1677_v1  ;;  %v2343_v3 = vand.u32 4294901760, %v1705_v39  ;;  %v2345_v39 = vand.u32 4294901760, %v1725_v55 }
  0x4f   :  { %422 = vmatpush.msrb.mxu0 %v2337_v40  ;;  %465 = vmatpush.msrb.mxu1 %v1568_v10  ;;  %v592_v10 = vand.u32 4294901760, %v591_v62  ;;  %v598_v5 = vand.u32 4294901760, %v597_v34  ;;  %v609_v62 = vsub.f32 %v1880_v14, %v608_v29  ;;  %v614_v40 = vand.u32 4294901760, %v1904_v16 }
  0x50   :  { %508 = vmatpush.msrb.mxu2 %v1783_v27  ;;  %587 = vmatpush.msrb.mxu3 %v586_v9  ;;  %v187_v20 = vsub.f32 %v1891_v0, %v186_v59  ;;  %v620_v9 = vand.u32 4294901760, %v1917_v22 }
  0x51   :  { %426 = vmatpush.msrb.mxu0 %v2339_v61  ;;  %467 = vmatpush.msrb.mxu1 %v1570_v11  ;;  %v118_v11 = vld [vmem:[#allocation2] sm:$0xff]  ;;  %v2342_v61 = vand.u32 4294901760, %v1691_v26  ;;  %v615_v1 = vsub.f32 %v1904_v16, %v614_v40 }
  0x52   :  { %510 = vmatpush.msrb.mxu2 %v1804_v37  ;;  %593 = vmatpush.msrb.mxu3 %v592_v10  ;;  %v1936_v34 = vand.u32 4294901760, %v118_v11  ;;  %v626_v10 = vand.u32 4294901760, %v1931_v53  ;;  %v188_v26 = vand.u32 4294901760, %v187_v20 }
  0x53   :  { %430 = vmatpush.msrb.mxu0 %v2340_v52  ;;  %469 = vmatpush.msrb.mxu1 %v1583_v17  ;;  %v604_v17 = vand.u32 4294901760, %v603_v4  ;;  %v2344_v52 = vand.u32 4294901760, %v1718_v49 }
  0x54   :  { %512 = vmatpush.msrb.mxu2 %v1817_v30  ;;  %599 = vmatpush.msrb.mxu3 %v598_v5  ;;  %v1954_v4 = vsub.f32 %v118_v11, %v1936_v34  ;;  %v627_v5 = vsub.f32 %v1931_v53, %v626_v10 }
  0x55   :  { %434 = vmatpush.msrb.mxu0 %v2341_v19  ;;  %471 = vmatpush.msrb.mxu1 %v1599_v25  ;;  %v610_v25 = vand.u32 4294901760, %v609_v62 }
  0x56   :  { %514 = vmatpush.msrb.mxu2 %v1829_v13  ;;  %605 = vmatpush.msrb.mxu3 %v604_v17  ;;  %v527_v11 = vand.u32 4294901760, %v1954_v4 }
  0x57   :  { %438 = vmatpush.msrb.mxu0 %v2342_v61  ;;  %473 = vmatpush.msrb.mxu1 %v1603_v28  ;;  %v621_v28 = vsub.f32 %v1917_v22, %v620_v9 }
  0x58   :  { %516 = vmatpush.msrb.mxu2 %v1841_v45  ;;  %611 = vmatpush.msrb.mxu3 %v610_v25 }
  0x59   :  { %442 = vmatpush.msrb.mxu0 %v2343_v3  ;;  %475 = vmatpush.msrb.mxu1 %v1621_v35  ;;  %v616_v35 = vand.u32 4294901760, %v615_v1  ;;  %v622_v49 = vand.u32 4294901760, %v621_v28 }
  0x5a   :  { %518 = vmatpush.msrb.mxu2 %v1854_v47  ;;  %189 = vmatmul.f32.vlgmr.msra.gmra.mxu0 %v188_v26 }
  0x5b   :  { %446 = vmatpush.msrb.mxu0 %v2344_v52  ;;  %477 = vmatpush.msrb.mxu1 %v1633_v41  ;;  %v628_v41 = vand.u32 4294901760, %v627_v5 }
  0x5c   :  { %520 = vmatpush.msrb.mxu2 %v1877_v6  ;;  %617 = vmatpush.msrb.mxu3 %v616_v35 }
  0x5d   :  { %450 = vmatpush.msrb.mxu0 %v2345_v39  ;;  %479 = vmatpush.msrb.mxu1 %v1649_v50  ;;  %v528_v50 = vsub.f32 %v1954_v4, %v527_v11  ;;  %v1275_v39 = vld [vmem:[#allocation10] ss:$0 sm:$0xff] }
  0x5e   :  { %522 = vmatpush.msrb.mxu2 %v1893_v15  ;;  %623 = vmatpush.msrb.mxu3 %v622_v49 }
  0x5f   :  { %637 = vmatpush.msra.mxu0 %v1713_v43  ;;  %481 = vmatpush.msrb.mxu1 %v1664_v57  ;;  %v2346_v57 = vand.u32 4294901760, %v1713_v43  ;;  %v529_v55 = vand.u32 4294901760, %v528_v50  ;;  %v2349_v43 = vand.u32 4294901760, %v1746_v38  ;;  %v877_v50 = vld [vmem:[#allocation11 + $0x58] sm:$0xff] }
  0x60   :  { %344 = vmatmul.f32.vlgmr.msra.gmra.mxu2 %v1891_v0  ;;  %383 = vmatmul.f32.vlgmr.msra.gmra.mxu3 %v186_v59  ;;  %v2348_v0 = vld [vmem:[#allocation22_spill] sm:$0xff] }
  0x61   :  { %640 = vmatpush.msra.mxu0 %v1728_v56  ;;  %483 = vmatpush.msrb.mxu1 %v1673_v63  ;;  %v2347_v63 = vand.u32 4294901760, %v1728_v56 }
  0x62   :  { %524 = vmatpush.msrb.mxu2 %v1909_v46  ;;  %629 = vmatpush.msrb.mxu3 %v628_v41 }
  0x63   :  { %643 = vmatpush.msra.mxu0 %v1746_v38  ;;  %485 = vmatpush.msrb.mxu1 %v1688_v18  ;;  %v2350_v18 = vand.u32 4294901760, %v1759_v58 }
  0x64   :  { %731 = vmatpush.msra.mxu2 %v2346_v57  ;;  %290 = vmatmul.f32.vlgmr.msra.gmra.mxu1 %v1867_v32  ;;  %v2119_v57 = vand.u32 4294901760, %v877_v50 }
  0x65   :  { %646 = vmatpush.msra.mxu0 %v1759_v58  ;;  %798 = vmatpush.msra.mxu3 %v1682_v8  ;;  %v2352_v58 = vand.u32 4294901760, %v1791_v24 }
  0x66   :  { %735 = vmatpush.msra.mxu2 %v2347_v63  ;;  %487 = vmatpush.msrb.mxu1 %v2348_v0  ;;  %v876_v63 = vld [vmem:[#allocation11 + $0x50] sm:$0xff] }
  0x67   :  { %649 = vmatpush.msra.mxu0 %v1776_v33  ;;  %800 = vmatpush.msra.mxu3 %v1697_v31  ;;  %v2124_v0 = vand.u32 4294901760, %v876_v63 }
  0x68   :  { %690 = vmatpush.msra.mxu1 %v1682_v8  ;;  %739 = vmatpush.msra.mxu2 %v2349_v43  ;;  %v2351_v8 = vand.u32 4294901760, %v1776_v33  ;;  %v2353_v33 = vand.u32 4294901760, %v1797_v23  ;;  %v875_v43 = vld [vmem:[#allocation11 + $0x48] sm:$0xff] }
  0x69   :  { %530 = vmatmul.f32.vlgmr.msrb.gmra.mxu2 %v529_v55  ;;  %652 = vmatpush.msra.mxu0 %v1791_v24  ;;  %v2355_v24 = vand.u32 4294901760, %v1827_v44  ;;  %v2122_v55 = vsub.f32 %v877_v50, %v2119_v57 }
  0x6a   :  { %692 = vmatpush.msra.mxu1 %v1697_v31  ;;  %743 = vmatpush.msra.mxu2 %v2350_v18  ;;  %v2354_v31 = vand.u32 4294901760, %v1810_v36 }
  0x6b   :  { %802 = vmatpush.msra.mxu3 %v1720_v54  ;;  %452 = vmatmul.f32.vlgmr.msrb.gmra.mxu0 %v1867_v32  ;;  %v953_v18 = vand.u32 4294901760, %v2122_v55 }
  0x6c   :  { %631 = vmatmul.f32.vlgmr.msrb.gmra.mxu3 %v1936_v34  ;;  %655 = vmatpush.msra.mxu0 %v1797_v23  ;;  %v2356_v23 = vand.u32 4294901760, %v1839_v2 }
  0x6d   :  { %694 = vmatpush.msra.mxu1 %v1720_v54  ;;  %747 = vmatpush.msra.mxu2 %v2351_v8  ;;  %v2130_v8 = vsub.f32 %v876_v63, %v2124_v0 }
  0x6e   :  { %804 = vmatpush.msra.mxu3 %v1735_v12  ;;  %489 = vmatmul.f32.vlgmr.msrb.gmra.mxu1 %v1867_v32 }
  0x6f   :  { %658 = vmatpush.msra.mxu0 %v1810_v36  ;;  %696 = vmatpush.msra.mxu1 %v1735_v12  ;;  %v881_v36 = vld [vmem:[#allocation11 + $0x78] sm:$0xff] }
  0x70   :  { %751 = vmatpush.msra.mxu2 %v2352_v58  ;;  %806 = vmatpush.msra.mxu3 %v1748_v7  ;;  %v2132_v58 = vand.u32 4294901760, %v875_v43 }
  0x71   :  { %661 = vmatpush.msra.mxu0 %v1827_v44  ;;  %698 = vmatpush.msra.mxu1 %v1748_v7  ;;  %v879_v44 = vld [vmem:[#allocation11 + $0x68] sm:$0xff] }
  0x72   :  { %755 = vmatpush.msra.mxu2 %v2353_v33  ;;  %808 = vmatpush.msra.mxu3 %v1761_v51  ;;  %v2070_v32 = vand.u32 4294901760, %v879_v44  ;;  %v874_v33 = vld [vmem:[#allocation11 + $0x40] sm:$0xff] }
  0x73   :  { %664 = vmatpush.msra.mxu0 %v1839_v2  ;;  %700 = vmatpush.msra.mxu1 %v1761_v51  ;;  %v2357_v51 = vand.u32 4294901760, %v1852_v48 }
  0x74   :  { %759 = vmatpush.msra.mxu2 %v2354_v31  ;;  %810 = vmatpush.msra.mxu3 %v1768_v60  ;;  %v954_v31 = vsub.f32 %v2122_v55, %v953_v18 }
  0x75   :  { %667 = vmatpush.msra.mxu0 %v1852_v48  ;;  %702 = vmatpush.msra.mxu1 %v1768_v60  ;;  %v878_v48 = vld [vmem:[#allocation11 + $0x60] sm:$0xff] }
  0x76   :  { %763 = vmatpush.msra.mxu2 %v2355_v24  ;;  %812 = vmatpush.msra.mxu3 %v1783_v27  ;;  %v959_v24 = vand.u32 4294901760, %v2130_v8 }
  0x77   :  { %670 = vmatpush.msra.mxu0 %v1865_v42  ;;  %704 = vmatpush.msra.mxu1 %v1783_v27  ;;  %v2072_v42 = vand.u32 4294901760, %v878_v48 }
  0x78   :  { %767 = vmatpush.msra.mxu2 %v2356_v23  ;;  %814 = vmatpush.msra.mxu3 %v1804_v37  ;;  %v2142_v23 = vsub.f32 %v875_v43, %v2132_v58 }
  0x79   :  { %673 = vmatpush.msra.mxu0 %v1880_v14  ;;  %706 = vmatpush.msra.mxu1 %v1804_v37 }
  0x7a   :  { %771 = vmatpush.msra.mxu2 %v2357_v51  ;;  %816 = vmatpush.msra.mxu3 %v1817_v30  ;;  %v2144_v51 = vand.u32 4294901760, %v874_v33 }
  0x7b   :  { %676 = vmatpush.msra.mxu0 %v1904_v16  ;;  %708 = vmatpush.msra.mxu1 %v1817_v30  ;;  %v2086_v16 = vsub.f32 %v878_v48, %v2072_v42 }
  0x7c   :  { %775 = vmatpush.msra.mxu2 %v602_v21  ;;  %818 = vmatpush.msra.mxu3 %v1829_v13 }
  0x7d   :  { %679 = vmatpush.msra.mxu0 %v1917_v22  ;;  %710 = vmatpush.msra.mxu1 %v1829_v13 }
  0x7e   :  { %779 = vmatpush.msra.mxu2 %v608_v29  ;;  %820 = vmatpush.msra.mxu3 %v1841_v45  ;;  %v2081_v29 = vsub.f32 %v879_v44, %v2070_v32  ;;  %v871_v44 = vld [vmem:[#allocation11 + $0x28] sm:$0xff] }
  0x7f   :  { %682 = vmatpush.msra.mxu0 %v1931_v53  ;;  %712 = vmatpush.msra.mxu1 %v1841_v45  ;;  %v880_v45 = vld [vmem:[#allocation11 + $0x70] sm:$0xff] }
  0x80   :  { %783 = vmatpush.msra.mxu2 %v614_v40  ;;  %822 = vmatpush.msra.mxu3 %v1854_v47  ;;  %v2068_v2 = vand.u32 4294901760, %v880_v45  ;;  %v941_v22 = vand.u32 4294901760, %v2081_v29  ;;  %v947_v40 = vand.u32 4294901760, %v2086_v16 }
  0x81   :  { %685 = vmatmul.f32.vlgmr.msra.gmra.mxu0 %v1954_v4  ;;  %714 = vmatpush.msra.mxu1 %v1854_v47  ;;  %v2066_v47 = vand.u32 4294901760, %v881_v36 }
  0x82   :  { %787 = vmatpush.msra.mxu2 %v620_v9  ;;  %824 = vmatpush.msra.mxu3 %v1877_v6  ;;  %v942_v17 = vsub.f32 %v2081_v29, %v941_v22  ;;  %v948_v61 = vsub.f32 %v2086_v16, %v947_v40 }
  0x83   :  { %716 = vmatpush.msra.mxu1 %v1877_v6  ;;  %v2075_v21 = vsub.f32 %v881_v36, %v2066_v47  ;;  %887 = vmatpush.msrb.mxu0 %v2066_v47 }
  0x84   :  { %791 = vmatpush.msra.mxu2 %v626_v10  ;;  %826 = vmatpush.msra.mxu3 %v1893_v15  ;;  %v943_v3 = vand.u32 4294901760, %v942_v17  ;;  %v949_v26 = vand.u32 4294901760, %v948_v61 }
  0x85   :  { %793 = vmatmul.f32.vlgmr.msra.gmra.mxu2 %v1936_v34  ;;  %718 = vmatpush.msra.mxu1 %v1893_v15  ;;  %v2078_v15 = vsub.f32 %v880_v45, %v2068_v2 }
  0x86   :  { %828 = vmatpush.msra.mxu3 %v1909_v46  ;;  %889 = vmatpush.msrb.mxu0 %v2068_v2 }
  0x87   :  { %830 = vmatmul.f32.vlgmr.msra.gmra.mxu3 %v1936_v34  ;;  %720 = vmatpush.msra.mxu1 %v1909_v46  ;;  %v929_v46 = vand.u32 4294901760, %v2075_v21  ;;  %v935_v59 = vand.u32 4294901760, %v2078_v15 }
  0x88   :  { %724 = vmatmul.f32.vlgmr.msra.gmra.mxu1 %v527_v11  ;;  %1083 = vmatpush.msrb.mxu3 %v2066_v47 }
  0x89   :  { %1030 = vmatpush.msrb.mxu2 %v2075_v21  ;;  %v930_v19 = vsub.f32 %v2075_v21, %v929_v46  ;;  %v936_v53 = vsub.f32 %v2078_v15, %v935_v59  ;;  %891 = vmatpush.msrb.mxu0 %v2070_v32 }
  0x8a   :  { %1085 = vmatpush.msrb.mxu3 %v2068_v2 }
  0x8b   :  { %1033 = vmatpush.msrb.mxu2 %v2078_v15  ;;  %v931_v9 = vand.u32 4294901760, %v930_v19  ;;  %v937_v34 = vand.u32 4294901760, %v936_v53  ;;  %893 = vmatpush.msrb.mxu0 %v2072_v42  ;;  %v870_v53 = vld [vmem:[#allocation11 + $0x20] sm:$0xff] }
  0x8c   :  { %1087 = vmatpush.msrb.mxu3 %v2070_v32 }
  0x8d   :  { %1036 = vmatpush.msrb.mxu2 %v2081_v29  ;;  %932 = vmatpush.msrb.mxu1 %v931_v9 }
  0x8e   :  { %1089 = vmatpush.msrb.mxu3 %v2072_v42  ;;  %895 = vmatpush.msrb.mxu0 %v2119_v57 }
  0x8f   :  { %1039 = vmatpush.msrb.mxu2 %v2086_v16  ;;  %938 = vmatpush.msrb.mxu1 %v937_v34  ;;  %v2188_v34 = vand.u32 4294901760, %v870_v53 }
  0x90   :  { %1091 = vmatpush.msrb.mxu3 %v2119_v57  ;;  %897 = vmatpush.msrb.mxu0 %v2124_v0 }
  0x91   :  { %944 = vmatpush.msrb.mxu1 %v943_v3  ;;  %1042 = vmatpush.msrb.mxu2 %v2122_v55 }
  0x92   :  { %1093 = vmatpush.msrb.mxu3 %v2124_v0  ;;  %899 = vmatpush.msrb.mxu0 %v2132_v58 }
  0x93   :  { %950 = vmatpush.msrb.mxu1 %v949_v26  ;;  %1045 = vmatpush.msrb.mxu2 %v2130_v8 }
  0x94   :  { %1095 = vmatpush.msrb.mxu3 %v2132_v58  ;;  %901 = vmatpush.msrb.mxu0 %v2144_v51 }
  0x95   :  { %1048 = vmatpush.msrb.mxu2 %v2142_v23 }
  0x96   :  { %1097 = vmatpush.msrb.mxu3 %v2144_v51 }
  0xd7   :  { %v190_v7 = vpop.f32.mrf.mxu0 }
  0xe1   :  { %v291_v27 = vpop.f32.mrf.mxu1 }
  0xe2   :  { %v292_v30 = vadd.f32 %v291_v27, %v190_v7  ;;  %v873_v27 = vld [vmem:[#allocation11 + $0x38] sm:$0xff]  ;;  %v955_v7 = vand.u32 4294901760, %v954_v31 }
  0xe3   :  { %v345_v38 = vpop.f32.mrf.mxu2  ;;  %v384_v56 = vpop.f32.mrf.mxu3 }
  0xe4   :  { %v346_v54 = vadd.f32 %v345_v38, %v292_v30  ;;  %v960_v30 = vsub.f32 %v2130_v8, %v959_v24  ;;  %v965_v38 = vand.u32 4294901760, %v2142_v23  ;;  %956 = vmatpush.msrb.mxu1 %v955_v7  ;;  %v1277_v8 = vld [vmem:[#allocation10 + $0x2] ss:$0 sm:$0xff] }
  0xe6   :  { %v385_v12 = vadd.f32 %v384_v56, %v346_v54  ;;  %v2154_v54 = vsub.f32 %v874_v33, %v2144_v51  ;;  %v2158_v56 = vand.u32 4294901760, %v873_v27 }
  0xe8   :  { %v453_v37 = vpop.f32.mrf.mxu0  ;;  %1051 = vmatpush.msrb.mxu2 %v2154_v54  ;;  %v2169_v45 = vsub.f32 %v873_v27, %v2158_v56  ;;  %903 = vmatpush.msrb.mxu0 %v2158_v56  ;;  %v866_v27 = vld [vmem:[#allocation11] sm:$0xff] }
  0xe9   :  { %v454_v60 = vadd.f32 %v453_v37, %v385_v12  ;;  %v872_v12 = vld [vmem:[#allocation11 + $0x30] sm:$0xff]  ;;  %v961_v37 = vand.u32 4294901760, %v960_v30  ;;  %1099 = vmatpush.msrb.mxu3 %v2158_v56 }
  0xea   :  { %v2165_v36 = vand.u32 4294901760, %v872_v12  ;;  %v977_v19 = vand.u32 4294901760, %v2169_v45  ;;  %1054 = vmatpush.msrb.mxu2 %v2169_v45 }
  0xeb   :  { %v490_v13 = vpop.f32.mrf.mxu1  ;;  %962 = vmatpush.msrb.mxu1 %v961_v37  ;;  %v2233_v37 = vand.u32 4294901760, %v866_v27 }
  0xec   :  { %v491_v14 = vadd.f32 %v490_v13, %v454_v60  ;;  %v531_v6 = vpop.f32.mrf.mxu2  ;;  %v966_v60 = vsub.f32 %v2142_v23, %v965_v38  ;;  %v971_v13 = vand.u32 4294901760, %v2154_v54  ;;  %905 = vmatpush.msrb.mxu0 %v2165_v36  ;;  %1101 = vmatpush.msrb.mxu3 %v2165_v36  ;;  %v978_v61 = vsub.f32 %v2169_v45, %v977_v19 }
  0xee   :  { %v532_v62 = vadd.f32 %v531_v6, %v491_v14  ;;  %v967_v48 = vand.u32 4294901760, %v966_v60  ;;  %v972_v14 = vsub.f32 %v2154_v54, %v971_v13  ;;  %v2177_v6 = vsub.f32 %v872_v12, %v2165_v36 }
  0xef   :  { %v632_v20 = vpop.f32.mrf.mxu3 }
  0xf0   :  { %v633_v1 = vadd.f32 %v632_v20, %v532_v62  ;;  %v2179_v62 = vand.u32 4294901760, %v871_v44  ;;  %968 = vmatpush.msrb.mxu1 %v967_v48  ;;  %v973_v17 = vand.u32 4294901760, %v972_v14  ;;  %v983_v20 = vand.u32 4294901760, %v2177_v6  ;;  %1057 = vmatpush.msrb.mxu2 %v2177_v6 }
  0xf1   :  { %v1018_v14 = vsub.f32 %v866_v27, %v2233_v37 }
  0xf2   :  { %v2186_v9 = vsub.f32 %v871_v44, %v2179_v62  ;;  %907 = vmatpush.msrb.mxu0 %v2179_v62  ;;  %974 = vmatpush.msrb.mxu1 %v973_v17 }
  0xf3   :  { %1103 = vmatpush.msrb.mxu3 %v2179_v62 }
  0xf4   :  { %v989_v3 = vand.u32 4294901760, %v2186_v9  ;;  %909 = vmatpush.msrb.mxu0 %v2188_v34  ;;  %1060 = vmatpush.msrb.mxu2 %v2186_v9 }
  0xf5   :  { %1105 = vmatpush.msrb.mxu3 %v2188_v34 }
  0xfe   :  { %v686_v25 = vpop.f32.mrf.mxu0 }
  0xff   :  { %v687_v10 = vadd.f32 %v686_v25, %v633_v1  ;;  %v869_v25 = vld [vmem:[#allocation11 + $0x18] sm:$0xff]  ;;  %v984_v1 = vsub.f32 %v2177_v6, %v983_v20 }
 0x100   :  { %v2203_v26 = vand.u32 4294901760, %v869_v25 }
 0x102   :  { %911 = vmatpush.msrb.mxu0 %v2203_v26  ;;  %1107 = vmatpush.msrb.mxu3 %v2203_v26 }
 0x105   :  { %v725_v28 = vpop.f32.mrf.mxu1 }
 0x106   :  { %v726_v4 = vadd.f32 %v725_v28, %v687_v10  ;;  %v2201_v10 = vsub.f32 %v870_v53, %v2188_v34  ;;  %v979_v28 = vand.u32 4294901760, %v978_v61  ;;  %v1019_v61 = vand.u32 4294901760, %v1018_v14 }
 0x108   :  { %v794_v52 = vpop.f32.mrf.mxu2  ;;  %980 = vmatpush.msrb.mxu1 %v979_v28  ;;  %1063 = vmatpush.msrb.mxu2 %v2201_v10  ;;  %v1020_v28 = vsub.f32 %v1018_v14, %v1019_v61 }
 0x109   :  { %v795_v35 = vadd.f32 %v794_v52, %v726_v4  ;;  %v868_v4 = vld [vmem:[#allocation11 + $0x10] sm:$0xff]  ;;  %v985_v52 = vand.u32 4294901760, %v984_v1 }
 0x10a   :  { %v831_v5 = vpop.f32.mrf.mxu3 }
 0x10b   :  { %v832_v49 = vadd.f32 %v831_v5, %v795_v35  ;;  %v990_v35 = vsub.f32 %v2186_v9, %v989_v3  ;;  %v2213_v5 = vsub.f32 %v869_v25, %v2203_v26  ;;  %986 = vmatpush.msrb.mxu1 %v985_v52 }
 0x10d   :  { %v2114_v11 = vadd.f32 %v1275_v39, %v832_v49  ;;  %v995_v39 = vand.u32 4294901760, %v2201_v10  ;;  %v2216_v49 = vand.u32 4294901760, %v868_v4  ;;  %v991_v50 = vand.u32 4294901760, %v990_v35  ;;  %1066 = vmatpush.msrb.mxu2 %v2213_v5 }
 0x10e   :  { %v1001_v43 = vand.u32 4294901760, %v2213_v5 }
 0x10f   :  { %837 = vadd.xlane.f32.xlu0 %v2114_v11  ;;  %v839_v41 = vmul.f32 %v2114_v11, %v2114_v11  ;;  %v996_v63 = vsub.f32 %v2201_v10, %v995_v39  ;;  %v1006_v31 = vsub.f32 %v868_v4, %v2216_v49  ;;  %913 = vmatpush.msrb.mxu0 %v2216_v49  ;;  %v1021_v4 = vand.u32 4294901760, %v1020_v28 }
 0x110   :  { %v1002_v30 = vsub.f32 %v2213_v5, %v1001_v43  ;;  %1109 = vmatpush.msrb.mxu3 %v2216_v49  ;;  %992 = vmatpush.msrb.mxu1 %v991_v50 }
 0x111   :  { %v997_v7 = vand.u32 4294901760, %v996_v63  ;;  %v1007_v60 = vand.u32 4294901760, %v1006_v31  ;;  %1069 = vmatpush.msrb.mxu2 %v1006_v31 }
 0x112   :  { %v1003_v44 = vand.u32 4294901760, %v1002_v30 }
 0x113   :  { %998 = vmatpush.msrb.mxu1 %v997_v7  ;;  %v1008_v53 = vsub.f32 %v1006_v31, %v1007_v60 }
 0x115   :  { %1004 = vmatpush.msrb.mxu1 %v1003_v44  ;;  %v1009_v25 = vand.u32 4294901760, %v1008_v53 }
 0x117   :  { %840 = vadd.xlane.f32.xlu0 %v839_v41  ;;  %v867_v41 = vld [vmem:[#allocation11 + $0x8] sm:$0xff]  ;;  %1010 = vmatpush.msrb.mxu1 %v1009_v25 }
 0x118   :  { %v2223_v33 = vand.u32 4294901760, %v867_v41 }
 0x11a   :  { %v1012_v12 = vsub.f32 %v867_v41, %v2223_v33  ;;  %915 = vmatpush.msrb.mxu0 %v2223_v33  ;;  %1111 = vmatpush.msrb.mxu3 %v2223_v33 }
 0x11c   :  { %v1013_v48 = vand.u32 4294901760, %v1012_v12  ;;  %917 = vmatpush.msrb.mxu0 %v2233_v37  ;;  %1072 = vmatpush.msrb.mxu2 %v1012_v12 }
 0x11d   :  { %1113 = vmatpush.msrb.mxu3 %v2233_v37 }
 0x11e   :  { %v1014_v17 = vsub.f32 %v1012_v12, %v1013_v48  ;;  %1124 = vmatpush.msra.mxu0 %v929_v46  ;;  %1075 = vmatpush.msrb.mxu2 %v1018_v14 }
 0x120   :  { %v1015_v1 = vand.u32 4294901760, %v1014_v17  ;;  %1128 = vmatpush.msra.mxu0 %v935_v59 }
 0x122   :  { %1132 = vmatpush.msra.mxu0 %v941_v22  ;;  %1016 = vmatpush.msrb.mxu1 %v1015_v1 }
 0x124   :  { %1136 = vmatpush.msra.mxu0 %v947_v40  ;;  %1022 = vmatpush.msrb.mxu1 %v1021_v4 }
 0x126   :  { %1191 = vmatpush.msra.mxu1 %v2066_v47  ;;  %1140 = vmatpush.msra.mxu0 %v953_v18 }
 0x128   :  { %1193 = vmatpush.msra.mxu1 %v2068_v2  ;;  %1144 = vmatpush.msra.mxu0 %v959_v24 }
 0x12a   :  { %1195 = vmatpush.msra.mxu1 %v2070_v32  ;;  %1148 = vmatpush.msra.mxu0 %v965_v38 }
 0x12c   :  { %1197 = vmatpush.msra.mxu1 %v2072_v42  ;;  %1152 = vmatpush.msra.mxu0 %v971_v13 }
 0x12e   :  { %1199 = vmatpush.msra.mxu1 %v2119_v57  ;;  %1156 = vmatpush.msra.mxu0 %v977_v19 }
 0x130   :  { %1201 = vmatpush.msra.mxu1 %v2124_v0  ;;  %1160 = vmatpush.msra.mxu0 %v983_v20  ;;  %v1276_v0 = vld [vmem:[#allocation10 + $0x1] ss:$0 sm:$0xff] }
 0x132   :  { %1203 = vmatpush.msra.mxu1 %v2132_v58  ;;  %1164 = vmatpush.msra.mxu0 %v989_v3 }
 0x134   :  { %1205 = vmatpush.msra.mxu1 %v2144_v51  ;;  %1168 = vmatpush.msra.mxu0 %v995_v39 }
 0x136   :  { %1207 = vmatpush.msra.mxu1 %v2158_v56  ;;  %1172 = vmatpush.msra.mxu0 %v1001_v43 }
 0x138   :  { %1209 = vmatpush.msra.mxu1 %v2165_v36  ;;  %1176 = vmatpush.msra.mxu0 %v1007_v60 }
 0x13a   :  { %1211 = vmatpush.msra.mxu1 %v2179_v62  ;;  %1180 = vmatpush.msra.mxu0 %v1013_v48 }
 0x13c   :  { %1213 = vmatpush.msra.mxu1 %v2188_v34  ;;  %1184 = vmatpush.msra.mxu0 %v1019_v61 }
 0x13e   :  { %1215 = vmatpush.msra.mxu1 %v2203_v26 }
 0x140   :  { %1217 = vmatpush.msra.mxu1 %v2216_v49 }
 0x142   :  { %1219 = vmatpush.msra.mxu1 %v2223_v33 }
 0x144   :  { %1221 = vmatpush.msra.mxu1 %v2233_v37 }
 0x182   :  { %v838_v21 = vpop.xlane.xlu0 %837 }
 0x183   :  { %v842_v47 = vmul.f32 0.03125, %v838_v21 }
 0x185   :  { %v844_v32 = vmul.f32 %v842_v47, %v842_v47  ;;  %v846_v55 = vsub.f32 %v2114_v11, %v842_v47  ;;  %v1278_v11 = vld [vmem:[%s2300_s6] ss:$0 sm:$0xff] }
 0x18a   :  { %v841_v2 = vpop.xlane.xlu0 %840 }
 0x18b   :  { %v843_v42 = vmul.f32 0.03125, %v841_v2 }
 0x18d   :  { %v845_v15 = vsub.f32 %v843_v42, %v844_v32 }
 0x18f   :  { %v847_v29 = vadd.f32 1e-05, %v845_v15 }
 0x191   :  { %1279 = vrsqrt.f32 %v847_v29  ;;  %vm854_vm1 = vweird.f32 %v847_v29 }
 0x197   :  { %v1280_v16 = vpop.eup %1279 }
 0x198   :  { %v849_v46 = vmul.f32 %v1280_v16, %v847_v29  ;;  %vm855_vm0 = vweird.f32 %v1280_v16 }
 0x199   :  { %vm856_vm2 = vmor %vm854_vm1, %vm855_vm0 }
 0x19a   :  { %v850_v59 = vmul.f32 %v1280_v16, %v849_v46 }
 0x19c   :  { %v851_v22 = vmul.f32 0.5, %v850_v59 }
 0x19e   :  { %v852_v40 = vsub.f32 1.5, %v851_v22 }
 0x1a0   :  { %v853_v57 = vmul.f32 %v1280_v16, %v852_v40 }
 0x1a2   :  { %v857_v18 = vsel %vm856_vm2, %v1280_v16, %v853_v57 }
 0x1a3   :  { %v858_v58 = vmul.f32 %v857_v18, %v846_v55 }
 0x1a5   :  { %v861_v24 = vmul.f32 %v1276_v0, %v858_v58 }
 0x1a7   :  { %v864_v23 = vadd.f32 %v1277_v8, %v861_v24 }
 0x1a9   :  { %1281 = vtanh.f32 %v864_v23 }
 0x1af   :  { %v1282_v51 = vpop.eup %1281 }
 0x1b0   :  { %1228 = vst [vmem:[#allocation14] sm:$0xff] %v1282_v51  ;;  %v918_v38 = vand.u32 4294901760, %v1282_v51 }
 0x1b1   :  { %1250 = dma.vmem_to_hbm [thread:$0]  %s1246_s5, 128, %s1248_s13, [#allocation15]  }
 0x1b2   :  { %1024 = vmatmul.f32.vlgmr.msrb.gmra.mxu1 %v918_v38  ;;  %v919_v54 = vsub.f32 %v1282_v51, %v918_v38 }
 0x1b4   :  { %1078 = vmatmul.f32.vlgmr.msrb.gmra.mxu2 %v919_v54  ;;  %v920_v56 = vand.u32 4294901760, %v919_v54 }
 0x1b6   :  { %1117 = vmatmul.f32.vlgmr.msrb.gmra.mxu3 %v920_v56  ;;  %v921_v13 = vsub.f32 %v919_v54, %v920_v56 }
 0x1b8   :  { %v922_v36 = vand.u32 4294901760, %v921_v13 }
 0x1ba   :  { %923 = vmatmul.f32.vlgmr.msrb.gmra.mxu0 %v922_v36  ;;  %1223 = vmatmul.f32.vlgmr.msra.gmra.mxu1 %v918_v38 }
 0x1c2   :  { %1186 = vmatmul.f32.vlgmr.msra.gmra.mxu0 %v918_v38 }
 0x22f   :  { %v1025_v45 = vpop.f32.mrf.mxu1 }
 0x237   :  { %v924_v6 = vpop.f32.mrf.mxu0  ;;  %v1079_v20 = vpop.f32.mrf.mxu2 }
 0x238   :  { %v925_v62 = vadd.f32 %v1278_v11, %v924_v6  ;;  %v1224_v52 = vpop.f32.mrf.mxu1 }
 0x239   :  { %v1118_v34 = vpop.f32.mrf.mxu3 }
 0x23a   :  { %v1026_v19 = vadd.f32 %v1025_v45, %v925_v62 }
 0x23c   :  { %v1080_v9 = vadd.f32 %v1079_v20, %v1026_v19 }
 0x23e   :  { %v1119_v3 = vadd.f32 %v1118_v34, %v1080_v9 }
 0x23f   :  { %v1187_v10 = vpop.f32.mrf.mxu0 }
 0x240   :  { %v1188_v26 = vadd.f32 %v1187_v10, %v1119_v3 }
 0x242   :  { %v1225_v35 = vadd.f32 %v1224_v52, %v1188_v26 }
 0x244   :  { %1227 = vst [vmem:[#allocation13] sm:$0xff] %v1225_v35 }
 0x245   :  { %1239 = dma.vmem_to_hbm [thread:$0]  %s1235_s17, 128, %s1237_s18, [#allocation4]  }
 0x246   :  { %1483 = dma.done.wait [#allocation4], 128  }
 0x247   :  { %1484 = vsyncadd [#allocation4], 4294967168 }
 0x248   :  { %1485 = dma.done.wait [#allocation15], 128  }
 0x249   :  { %1486 = vsyncadd [#allocation15], 4294967168 }
 0x24a   :  { %1259 = vsyncpa [#allocation3], 1 }
 0x24b   :  { %1260 = vsyncpa [#allocation6], 1 }
 0x24c   :  { %1261 = vsyncpa [#allocation9], 1 }
 0x24d   :  { %1262 = vsyncpa [#allocation12], 1 }
 0x24e   :  { %1263 = vsyncpa [#allocation4], 1 }
 0x24f   :  { %1264 = vsyncpa [#allocation15], 1 }

</bundles_post_ra>
